<compile_context>
chip_gen: v7x
topology: tpu7x:2x2x1
jax: 0.10.0
libtpu: 0.0.40
codegen_flags: <defaults>
</compile_context>

<pallas_src>
import functools
import math

import jax
import jax.numpy as jnp
from jax.experimental import pallas as pl
from jax.experimental.pallas import tpu as pltpu

LANE = 128   # lane width
SUB = 16     # bf16 sublane packing granularity


def _round_up(x, m):
    return (x + m - 1) // m * m


def _pick_tile(dim, max_tile, mult):
    """Largest tile <= max_tile, multiple of `mult`, dividing round_up(dim, mult)."""
    dim_p = _round_up(max(dim, mult), mult)
    if dim_p <= max_tile:
        return dim_p
    t = (max_tile // mult) * mult
    while t >= mult:
        if dim_p % t == 0:
            return t
        t -= mult
    return mult


def _block_spec(shape, index_map, single=False):
    """BlockSpec; best-effort single buffering for constant-index blocks."""
    if single:
        try:
            return pl.BlockSpec(shape, index_map, pipeline_mode=pl.Buffered(1))
        except Exception:                      # older API without pipeline_mode
            pass
    return pl.BlockSpec(shape, index_map)


# ---------------------------------------------------------------------------
# Fused Fire kernel
# ---------------------------------------------------------------------------
def _fire_fused_kernel(a_ref, wsq_ref, bsq_ref, wexp_ref, bexp_ref, o_ref, sw_ref,
                       *, n_img, img_h, img_w, wr, hp, cp, tm, in_align):
    j = pl.program_id(0)          # output-channel tile (outer, slow axis)
    i = pl.program_id(1)          # output-row tile      (inner, fast axis)

    # ---- phase 0 (first grid step only): squeeze 1x1 conv + bias + ReLU,
    #      written straight into the width-folded bf16 VMEM scratch. ----
    @pl.when((j == 0) & (i == 0))
    def _():
        sw_ref[...] = jnp.zeros(sw_ref.shape, sw_ref.dtype)   # zero pad/border rows
        wsq = wsq_ref[...]                                    # (Cin_p, Cp) bf16
        bsq = bsq_ref[...]                                    # (1, Cp)   f32

        @pl.loop(0, n_img)
        def _(ni):
            @pl.loop(0, img_h)
            def _(hi):
                r_in = (ni * img_h + hi) * img_w
                if in_align > 1:
                    r_in = pl.multiple_of(r_in, in_align)
                a_row = a_ref[pl.ds(r_in, img_w), :]                       # (W, Cin_p)
                s_row = jnp.dot(a_row, wsq, preferred_element_type=jnp.float32)
                s_row = jnp.maximum(s_row + bsq, 0.0)                      # (W, Cp) f32
                z = jnp.zeros((1, cp), jnp.float32)
                left = jnp.concatenate([z, s_row[:-1, :]], axis=0)         # s[.., w-1]
                right = jnp.concatenate([s_row[1:, :], z], axis=0)         # s[.., w+1]
                sw_row = jnp.concatenate([left, s_row, right], axis=1)     # (W, 3*Cp)
                r_out = pl.multiple_of((ni * hp + hi + 1) * wr, SUB)
                sw_ref[pl.ds(r_out, img_w), :] = sw_row.astype(sw_ref.dtype)

    # ---- expand phase (every grid step): 3 height-tap shifted matmuls over
    #      the width-folded scratch; expand1x1 is folded into the centre tap's
    #      first output columns; bias + ReLU epilogue in f32. ----
    base = i * tm
    acc = None
    for t in range(3):                                   # static unroll, contiguous dots
        start = pl.multiple_of(base + t * wr, SUB)
        a_t = sw_ref[pl.ds(start, tm), :]                # (tm, 3*Cp) bf16
        d = jnp.dot(a_t, wexp_ref[t], preferred_element_type=jnp.float32)
        acc = d if acc is None else acc + d
    o_ref[...] = jnp.maximum(acc + bexp_ref[...], 0.0).astype(o_ref.dtype)


# ---------------------------------------------------------------------------
# Parameters (deterministic) + kernel-layout packing (hoisted out of forward)
# ---------------------------------------------------------------------------
def init_fire_params(key, inplanes, squeeze_planes, expand1x1_planes, expand3x3_planes):
    ks = jax.random.split(key, 6)

    def norm(k, shape, fan_in):
        return math.sqrt(2.0 / fan_in) * jax.random.normal(k, shape, jnp.float32)

    return {
        "w_sq": norm(ks[0], (inplanes, squeeze_planes), inplanes),                 # (Cin, Cs)
        "b_sq": 0.05 * jax.random.normal(ks[1], (squeeze_planes,), jnp.float32),
        "w_e1": norm(ks[2], (squeeze_planes, expand1x1_planes), squeeze_planes),   # (Cs, C1)
        "b_e1": 0.05 * jax.random.normal(ks[3], (expand1x1_planes,), jnp.float32),
        "w_e3": norm(ks[4], (3, 3, squeeze_planes, expand3x3_planes),              # HWIO
                     9 * squeeze_planes),
        "b_e3": 0.05 * jax.random.normal(ks[5], (expand3x3_planes,), jnp.float32),
    }


def pack_fire_params(raw):
    """Pre-pad / pre-fuse weights into the kernel layout (bf16, lane-dense)."""
    cin, cs = raw["w_sq"].shape
    c1 = raw["w_e1"].shape[1]
    c3 = raw["w_e3"].shape[3]

    cin_p = _round_up(cin, LANE)
    cp = _round_up(cs, LANE)              # lane-padded squeeze channels
    np_e = _round_up(c1 + c3, LANE)
    ke = 3 * cp                           # width-folded K (dj = 0,1,2 blocks)

    w_sq = jnp.pad(raw["w_sq"], ((0, cin_p - cin), (0, cp - cs))).astype(jnp.bfloat16)
    b_sq = jnp.pad(raw["b_sq"], (0, cp - cs)).reshape(1, cp).astype(jnp.float32)

    # expand: fuse expand1x1 + expand3x3 + concat into one 3-tap weight tensor,
    # K laid out with a stride of Cp (=128) per width tap so the kernel consumes
    # the lane-padded squeeze scratch directly (no narrowing / re-pad).
    w_exp = jnp.zeros((3, ke, np_e), jnp.float32)
    for dj in range(3):
        w_exp = w_exp.at[:, dj * cp:dj * cp + cs, c1:c1 + c3].set(raw["w_e3"][:, dj])
    w_exp = w_exp.at[1, cp:cp + cs, :c1].set(raw["w_e1"])          # 1x1 @ centre tap
    w_exp = w_exp.astype(jnp.bfloat16)
    b_exp = jnp.pad(jnp.concatenate([raw["b_e1"], raw["b_e3"]]),
                    (0, np_e - (c1 + c3))).reshape(1, np_e).astype(jnp.float32)

    return {"w_sq": w_sq, "b_sq": b_sq, "w_exp": w_exp, "b_exp": b_exp,
            "cp": cp, "c1": c1, "c3": c3}


# ---------------------------------------------------------------------------
# Forward pass
# ---------------------------------------------------------------------------
def fire_forward(x_nchw, packed):
    n, cin, img_h, img_w = x_nchw.shape
    cp, c1, c3 = packed["cp"], packed["c1"], packed["c3"]
    cin_p = packed["w_sq"].shape[0]
    ke, np_e = packed["w_exp"].shape[1], packed["w_exp"].shape[2]

    hp = img_h + 2                              # padded height (3x3, pad=1)
    wr = _round_up(img_w, SUB)                  # 16-aligned row stride per h-row
    m_out = n * hp * wr                         # output rows on the padded grid
    tm = _pick_tile(m_out, 256, SUB)
    tn = _pick_tile(np_e, 256, LANE)
    mp_out = _round_up(m_out, tm)               # == m_out (tm divides it)
    rs = mp_out + 2 * wr                        # scratch rows incl. tap halo

    # -- input: NCHW -> NHWC, flatten to (pixels, channels), bf16, lane-pad.
    mx = n * img_h * img_w
    mx_p = _round_up(mx, SUB)
    a = jnp.transpose(x_nchw, (0, 2, 3, 1)).reshape(mx, cin)
    a = jnp.pad(a.astype(jnp.bfloat16), ((0, mx_p - mx), (0, cin_p - cin)))

    grid = (np_e // tn, mp_out // tm)           # channel tiles OUTER, row tiles INNER

    kernel = functools.partial(
        _fire_fused_kernel, n_img=n, img_h=img_h, img_w=img_w, wr=wr, hp=hp,
        cp=cp, tm=tm, in_align=math.gcd(img_w, SUB))

    # VMEM budget from the actual buffers (A/wsq/bsq single copy, wexp/bexp/out
    # double-buffered, plus the persistent scratch), with headroom; capped so it
    # also fits v7x's 64 MiB/TC.
    bytes_needed = (mx_p * cin_p * 2 + cin_p * cp * 2 + cp * 4
                    + 2 * (3 * ke * tn * 2 + tn * 4)
                    + 2 * tm * tn * 4
                    + rs * 3 * cp * 2)
    vmem_limit = int(min(max(2 * bytes_needed + (8 << 20), 24 << 20), 48 << 20))

    out = pl.pallas_call(
        kernel,
        out_shape=jax.ShapeDtypeStruct((mp_out, np_e), jnp.float32),
        grid_spec=pltpu.PrefetchScalarGridSpec(
            num_scalar_prefetch=0,
            grid=grid,
            in_specs=[
                _block_spec((mx_p, cin_p), lambda j, i: (0, 0), single=True),
                _block_spec((cin_p, cp), lambda j, i: (0, 0), single=True),
                _block_spec((1, cp), lambda j, i: (0, 0), single=True),
                pl.BlockSpec((3, ke, tn), lambda j, i: (0, 0, j)),   # constant on inner axis
                pl.BlockSpec((1, tn), lambda j, i: (0, j)),
            ],
            out_specs=pl.BlockSpec((tm, tn), lambda j, i: (i, j)),
            scratch_shapes=[pltpu.VMEM((rs, 3 * cp), jnp.bfloat16)],
        ),
        compiler_params=pltpu.CompilerParams(
            dimension_semantics=("arbitrary", "arbitrary"),
            vmem_limit_bytes=vmem_limit,
        ),
    )(a, packed["w_sq"], packed["b_sq"], packed["w_exp"], packed["b_exp"])

    e = out[:m_out].reshape(n, hp, wr, np_e)[:, :img_h, :img_w, :c1 + c3]
    return jnp.transpose(e, (0, 3, 1, 2))       # NHWC -> NCHW


# ---------------------------------------------------------------------------
# Pure-JAX reference (same bf16 operand rounding) for a sanity check
# ---------------------------------------------------------------------------
def fire_reference(x_nchw, raw):
    bf = lambda t: t.astype(jnp.bfloat16).astype(jnp.float32)
    x = bf(jnp.transpose(x_nchw, (0, 2, 3, 1)))
    s = jnp.maximum(jnp.einsum("nhwk,kc->nhwc", x, bf(raw["w_sq"])) + raw["b_sq"], 0.0)
    s = bf(s)                                   # kernel holds the squeeze act. in bf16
    e1 = jnp.maximum(jnp.einsum("nhwk,kc->nhwc", s, bf(raw["w_e1"])) + raw["b_e1"], 0.0)
    h, w = x.shape[1], x.shape[2]
    sp = jnp.pad(s, ((0, 0), (1, 1), (1, 1), (0, 0)))
    e3 = raw["b_e3"]
    for di in range(3):
        for dj in range(3):
            e3 = e3 + jnp.einsum("nhwk,kc->nhwc",
                                 sp[:, di:di + h, dj:dj + w, :],
                                 bf(raw["w_e3"][di, dj]))
    e3 = jnp.maximum(e3, 0.0)
    out = jnp.concatenate([e1, e3], axis=-1)
    return jnp.transpose(out, (0, 3, 1, 2))


if __name__ == "__main__":
    key = jax.random.PRNGKey(0)
    pkey, xkey = jax.random.split(key)

    N, INPLANES, H, W = 2, 32, 16, 16
    SQUEEZE, EXPAND1, EXPAND3 = 16, 64, 64

    raw = init_fire_params(pkey, INPLANES, SQUEEZE, EXPAND1, EXPAND3)
    packed = pack_fire_params(raw)
    x = jax.random.normal(xkey, (N, INPLANES, H, W), jnp.float32)       # NCHW input

    fwd = jax.jit(lambda inp: fire_forward(inp, packed))
    out = jax.block_until_ready(fwd(x))

    assert out.shape == (N, EXPAND1 + EXPAND3, H, W), out.shape
    assert bool(jnp.all(jnp.isfinite(out)))

    ref = fire_reference(x, raw)
    assert bool(jnp.allclose(out, ref, atol=5e-2, rtol=5e-2)), \
        float(jnp.max(jnp.abs(out - ref)))

    print("KERNEL_OK")
</pallas_src>

<mosaic_0001>
module attributes {stable_mosaic.version = 11 : i64} {
  func.func @_fire_fused_kernel(%arg0: i32, %arg1: i32, %arg2: memref<512x128xbf16, #tpu.memory_space<vmem>>, %arg3: memref<128x128xbf16, #tpu.memory_space<vmem>>, %arg4: memref<1x128xf32, #tpu.memory_space<vmem>>, %arg5: memref<3x384x128xbf16, #tpu.memory_space<vmem>>, %arg6: memref<1x128xf32, #tpu.memory_space<vmem>>, %arg7: memref<192x128xf32, #tpu.memory_space<vmem>>, %arg8: memref<608x384xbf16, #tpu.memory_space<vmem>>) attributes {dimension_semantics = [#tpu.dimension_semantics<arbitrary>, #tpu.dimension_semantics<arbitrary>], iteration_bounds = array<i64: 1, 3>, scalar_prefetch = 0 : i64, scratch_operands = 1 : i64, tpu.core_type = #tpu.core_type<tc>, window_params = [{pipeline_mode = #tpu.pipeline_mode<synchronous>, transform_indices = @transform_0, window_bounds = array<i64: 512, 128>}, {pipeline_mode = #tpu.pipeline_mode<synchronous>, transform_indices = @transform_1, window_bounds = array<i64: 128, 128>}, {pipeline_mode = #tpu.pipeline_mode<synchronous>, transform_indices = @transform_2, window_bounds = array<i64: 1, 128>}, {transform_indices = @transform_3, window_bounds = array<i64: 3, 384, 128>}, {transform_indices = @transform_4, window_bounds = array<i64: 1, 128>}, {transform_indices = @transform_5, window_bounds = array<i64: 192, 128>}]} {
    %c0_i32 = arith.constant 0 : i32
    %0 = arith.cmpi eq, %arg0, %c0_i32 : i32
    %c0_i32_0 = arith.constant 0 : i32
    %1 = arith.cmpi eq, %arg1, %c0_i32_0 : i32
    %2 = arith.andi %0, %1 : i1
    %3 = arith.extui %2 : i1 to i32
    %c0_i32_1 = arith.constant 0 : i32
    %4 = arith.cmpi ne, %3, %c0_i32_1 : i32
    scf.if %4 {
      %cst_19 = arith.constant 0.000000e+00 : bf16
      %35 = vector.broadcast %cst_19 : bf16 to vector<608x384xbf16>
      %c0_20 = arith.constant 0 : index
      %c0_21 = arith.constant 0 : index
      %36 = vector.load %arg8[%c0_20, %c0_21] : memref<608x384xbf16, #tpu.memory_space<vmem>>, vector<608x384xbf16>
      tpu.vector_store %arg8[%c0_20, %c0_21], %35 {strides = array<i32>} : memref<608x384xbf16, #tpu.memory_space<vmem>>, vector<608x384xbf16>,
      %c0_22 = arith.constant 0 : index
      %c0_23 = arith.constant 0 : index
      %37 = vector.load %arg3[%c0_22, %c0_23] : memref<128x128xbf16, #tpu.memory_space<vmem>>, vector<128x128xbf16>
      %c0_24 = arith.constant 0 : index
      %c0_25 = arith.constant 0 : index
      %38 = vector.load %arg4[%c0_24, %c0_25] : memref<1x128xf32, #tpu.memory_space<vmem>>, vector<1x128xf32>
      %c0_i32_26 = arith.constant 0 : i32
      %c2_i32 = arith.constant 2 : i32
      %39 = arith.addi %c0_i32_26, %c2_i32 : i32
      %c1_i32 = arith.constant 1 : i32
      scf.for %arg9 = %c0_i32_26 to %39 step %c1_i32  : i32 {
        %c1_i32_28 = arith.constant 1 : i32
        %40 = arith.muli %arg9, %c1_i32_28 : i32
        %c0_i32_29 = arith.constant 0 : i32
        %41 = arith.addi %c0_i32_29, %40 : i32
        %c0_i32_30 = arith.constant 0 : i32
        %c16_i32_31 = arith.constant 16 : i32
        %42 = arith.addi %c0_i32_30, %c16_i32_31 : i32
        %c1_i32_32 = arith.constant 1 : i32
        scf.for %arg10 = %c0_i32_30 to %42 step %c1_i32_32  : i32 {
          %c1_i32_34 = arith.constant 1 : i32
          %43 = arith.muli %arg10, %c1_i32_34 : i32
          %c0_i32_35 = arith.constant 0 : i32
          %44 = arith.addi %c0_i32_35, %43 : i32
          %c16_i32_36 = arith.constant 16 : i32
          %45 = arith.muli %41, %c16_i32_36 : i32
          %46 = arith.addi %45, %44 : i32
          %c16_i32_37 = arith.constant 16 : i32
          %47 = arith.muli %46, %c16_i32_37 : i32
          %48 = tpu.assume_multiple %47, 16 : i32
          %49 = arith.index_cast %48 : i32 to index
          %c0_38 = arith.constant 0 : index
          %50 = vector.load %arg2[%49, %c0_38] : memref<512x128xbf16, #tpu.memory_space<vmem>>, vector<16x128xbf16>
          %cst_39 = arith.constant dense<0.000000e+00> : vector<16x128xf32>
          %51 = tpu.matmul %50, %37, %cst_39 {dimension_numbers = #tpu.dot_dimension_numbers<[1], [0], [0], [1], [0, 0, 1, 1], [], []>} : vector<16x128xbf16>, vector<128x128xbf16>, vector<16x128xf32> -> vector<16x128xf32>
          %52 = vector.broadcast %38 : vector<1x128xf32> to vector<16x128xf32>
          %53 = arith.addf %51, %52 : vector<16x128xf32>
          %cst_40 = arith.constant 0.000000e+00 : f32
          %54 = vector.broadcast %cst_40 : f32 to vector<16x128xf32>
          %55 = arith.maximumf %53, %54 : vector<16x128xf32>
          %cst_41 = arith.constant 0.000000e+00 : f32
          %56 = vector.broadcast %cst_41 : f32 to vector<1x128xf32>
          %57 = vector.extract_strided_slice %55 {offsets = [0, 0], sizes = [15, 128], strides = [1, 1]} : vector<16x128xf32> to vector<15x128xf32>
          %58 = tpu.concatenate %56, %57 in 0 : vector<1x128xf32>, vector<15x128xf32> -> vector<16x128xf32>
          %59 = vector.extract_strided_slice %55 {offsets = [1, 0], sizes = [15, 128], strides = [1, 1]} : vector<16x128xf32> to vector<15x128xf32>
          %60 = tpu.concatenate %59, %56 in 0 : vector<15x128xf32>, vector<1x128xf32> -> vector<16x128xf32>
          %61 = tpu.concatenate %58, %55, %60 in 1 : vector<16x128xf32>, vector<16x128xf32>, vector<16x128xf32> -> vector<16x384xf32>
          %c18_i32 = arith.constant 18 : i32
          %62 = arith.muli %41, %c18_i32 : i32
          %63 = arith.addi %62, %44 : i32
          %c1_i32_42 = arith.constant 1 : i32
          %64 = arith.addi %63, %c1_i32_42 : i32
          %c16_i32_43 = arith.constant 16 : i32
          %65 = arith.muli %64, %c16_i32_43 : i32
          %66 = tpu.assume_multiple %65, 16 : i32
          %67 = arith.truncf %61 : vector<16x384xf32> to vector<16x384xbf16>
          %68 = arith.index_cast %66 : i32 to index
          %c0_44 = arith.constant 0 : index
          %69 = vector.load %arg8[%68, %c0_44] : memref<608x384xbf16, #tpu.memory_space<vmem>>, vector<16x384xbf16>
          tpu.vector_store %arg8[%68, %c0_44], %67 {strides = array<i32>} : memref<608x384xbf16, #tpu.memory_space<vmem>>, vector<16x384xbf16>,
        }
        %c16_i32_33 = arith.constant 16 : i32
      }
      %c2_i32_27 = arith.constant 2 : i32
    } else {
    }
    %c192_i32 = arith.constant 192 : i32
    %5 = arith.muli %arg1, %c192_i32 : i32
    %c0_i32_2 = arith.constant 0 : i32
    %6 = arith.addi %5, %c0_i32_2 : i32
    %7 = tpu.assume_multiple %6, 16 : i32
    %8 = arith.index_cast %7 : i32 to index
    %c0 = arith.constant 0 : index
    %9 = vector.load %arg8[%8, %c0] : memref<608x384xbf16, #tpu.memory_space<vmem>>, vector<192x384xbf16>
    %c0_3 = arith.constant 0 : index
    %c0_4 = arith.constant 0 : index
    %c0_5 = arith.constant 0 : index
    %10 = vector.load %arg5[%c0_3, %c0_4, %c0_5] : memref<3x384x128xbf16, #tpu.memory_space<vmem>>, vector<1x384x128xbf16>
    %11 = vector.shape_cast %10 : vector<1x384x128xbf16> to vector<384x128xbf16>
    %cst = arith.constant dense<0.000000e+00> : vector<192x128xf32>
    %12 = tpu.matmul %9, %11, %cst {dimension_numbers = #tpu.dot_dimension_numbers<[1], [0], [0], [1], [0, 0, 1, 1], [], []>} : vector<192x384xbf16>, vector<384x128xbf16>, vector<192x128xf32> -> vector<192x128xf32>
    %c16_i32 = arith.constant 16 : i32
    %13 = arith.addi %5, %c16_i32 : i32
    %14 = tpu.assume_multiple %13, 16 : i32
    %15 = arith.index_cast %14 : i32 to index
    %c0_6 = arith.constant 0 : index
    %16 = vector.load %arg8[%15, %c0_6] : memref<608x384xbf16, #tpu.memory_space<vmem>>, vector<192x384xbf16>
    %c1 = arith.constant 1 : index
    %c0_7 = arith.constant 0 : index
    %c0_8 = arith.constant 0 : index
    %17 = vector.load %arg5[%c1, %c0_7, %c0_8] : memref<3x384x128xbf16, #tpu.memory_space<vmem>>, vector<1x384x128xbf16>
    %18 = vector.shape_cast %17 : vector<1x384x128xbf16> to vector<384x128xbf16>
    %cst_9 = arith.constant dense<0.000000e+00> : vector<192x128xf32>
    %19 = tpu.matmul %16, %18, %cst_9 {dimension_numbers = #tpu.dot_dimension_numbers<[1], [0], [0], [1], [0, 0, 1, 1], [], []>} : vector<192x384xbf16>, vector<384x128xbf16>, vector<192x128xf32> -> vector<192x128xf32>
    %20 = arith.addf %12, %19 : vector<192x128xf32>
    %c32_i32 = arith.constant 32 : i32
    %21 = arith.addi %5, %c32_i32 : i32
    %22 = tpu.assume_multiple %21, 16 : i32
    %23 = arith.index_cast %22 : i32 to index
    %c0_10 = arith.constant 0 : index
    %24 = vector.load %arg8[%23, %c0_10] : memref<608x384xbf16, #tpu.memory_space<vmem>>, vector<192x384xbf16>
    %c2 = arith.constant 2 : index
    %c0_11 = arith.constant 0 : index
    %c0_12 = arith.constant 0 : index
    %25 = vector.load %arg5[%c2, %c0_11, %c0_12] : memref<3x384x128xbf16, #tpu.memory_space<vmem>>, vector<1x384x128xbf16>
    %26 = vector.shape_cast %25 : vector<1x384x128xbf16> to vector<384x128xbf16>
    %cst_13 = arith.constant dense<0.000000e+00> : vector<192x128xf32>
    %27 = tpu.matmul %24, %26, %cst_13 {dimension_numbers = #tpu.dot_dimension_numbers<[1], [0], [0], [1], [0, 0, 1, 1], [], []>} : vector<192x384xbf16>, vector<384x128xbf16>, vector<192x128xf32> -> vector<192x128xf32>
    %28 = arith.addf %20, %27 : vector<192x128xf32>
    %c0_14 = arith.constant 0 : index
    %c0_15 = arith.constant 0 : index
    %29 = vector.load %arg6[%c0_14, %c0_15] : memref<1x128xf32, #tpu.memory_space<vmem>>, vector<1x128xf32>
    %30 = vector.broadcast %29 : vector<1x128xf32> to vector<192x128xf32>
    %31 = arith.addf %28, %30 : vector<192x128xf32>
    %cst_16 = arith.constant 0.000000e+00 : f32
    %32 = vector.broadcast %cst_16 : f32 to vector<192x128xf32>
    %33 = arith.maximumf %31, %32 : vector<192x128xf32>
    %c0_17 = arith.constant 0 : index
    %c0_18 = arith.constant 0 : index
    %34 = vector.load %arg7[%c0_17, %c0_18] : memref<192x128xf32, #tpu.memory_space<vmem>>, vector<192x128xf32>
    tpu.vector_store %arg7[%c0_17, %c0_18], %33 {strides = array<i32>} : memref<192x128xf32, #tpu.memory_space<vmem>>, vector<192x128xf32>,
    return
  }
  func.func @transform_0(%arg0: i32, %arg1: i32) -> (i32, i32) {
    %c0_i32 = arith.constant 0 : i32
    %c0_i32_0 = arith.constant 0 : i32
    %c0_i32_1 = arith.constant 0 : i32
    return %c0_i32, %c0_i32_0 : i32, i32
  }
  func.func @transform_1(%arg0: i32, %arg1: i32) -> (i32, i32) {
    %c0_i32 = arith.constant 0 : i32
    %c0_i32_0 = arith.constant 0 : i32
    %c0_i32_1 = arith.constant 0 : i32
    return %c0_i32, %c0_i32_0 : i32, i32
  }
  func.func @transform_2(%arg0: i32, %arg1: i32) -> (i32, i32) {
    %c0_i32 = arith.constant 0 : i32
    %c0_i32_0 = arith.constant 0 : i32
    %c0_i32_1 = arith.constant 0 : i32
    return %c0_i32, %c0_i32_0 : i32, i32
  }
  func.func @transform_3(%arg0: i32, %arg1: i32) -> (i32, i32, i32) {
    %c0_i32 = arith.constant 0 : i32
    %c0_i32_0 = arith.constant 0 : i32
    %c0_i32_1 = arith.constant 0 : i32
    return %c0_i32, %c0_i32_0, %arg0 : i32, i32, i32
  }
  func.func @transform_4(%arg0: i32, %arg1: i32) -> (i32, i32) {
    %c0_i32 = arith.constant 0 : i32
    %c0_i32_0 = arith.constant 0 : i32
    return %c0_i32, %arg0 : i32, i32
  }
  func.func @transform_5(%arg0: i32, %arg1: i32) -> (i32, i32) {
    %c0_i32 = arith.constant 0 : i32
    return %arg1, %arg0 : i32, i32
  }
}

</mosaic_0001>

<bundles_post_ra>
// kernel: _lambda_.1
= control target key start
LH: loop header
LB: loop body
LE: loop exit
PB: predicated region body
PF: predicated region fallthrough
CT: control target
= control target key end

     0   :  { %s3243_s18 = smov 0   ;;  %s3245_s19 = smov 0   ;;  %s4175_s0 = inlined_call_operand.vmem [shape: bf16[512,128], index: 0, kind: input, shape index: {}]   ;;  %s4176_s1 = inlined_call_operand.vmem [shape: bf16[128,128], index: 1, kind: input, shape index: {}]   ;;  %s4177_s2 = inlined_call_operand.vmem [shape: f32[1,128], index: 2, kind: input, shape index: {}]   ;;  %s4178_s3 = inlined_call_operand.vmem [shape: bf16[3,384,128], index: 3, kind: input, shape index: {}]   ;;  %s4179_s4 = inlined_call_operand.vmem [shape: f32[1,128], index: 4, kind: input, shape index: {}]   ;;  %s4180_s5 = inlined_call_operand.vmem [shape: f32[576,128], index: 5, kind: output, shape index: {}]  }
   0x1   :  { %s3247_s20 = smov 0  }
   0x2 LB: > { %s24_s21 = sadd.s32 1, %s3196_s19  ;;  %p2246_p0 = scmp.ge.s32.totalorder %s3200_s20, 1  ;;  %s3200_s20 = sphi %s3247_s20, %s15_s20   ;;  %s3196_s19 = sphi %s3245_s19, %s4182_s19   ;;  %s3192_s18 = sphi %s3243_s18, %s4181_s18  }
   0x3   : > { %p25_p1 = scmp.ge.s32.totalorder %s24_s21, 3  ;;  %p208_p2 = scmp.lt.s32.totalorder %s3200_s20, 4 }
   0x5   : > { %s4184_s21 = smov (%p25_p1, %s24_s21), 0  ;;  %p209_p3 = pnand %p2246_p0, %p208_p2 }
   0x6   : > { %s248_s22 = smul.u32 (!%p209_p3), 24, %s3192_s18  ;;  %p259_p4 = scmp.eq.s32.totalorder (!%p209_p3), %s3192_s18, 0 }
   0x7   : > { %212 = sbr.rel (%p209_p3) target bundleno = 802 (0x322), region = 40 }
   0x8   : > { %p249_p5 = scmp.lt.s32.totalorder (!%p209_p3), %s248_s22, 71 }
   0xe   : > { %s4186_s22 = smov (!%p249_p5, %s248_s22), 71  ;;  %263 = sbr.rel (!%p259_p4) target bundleno = 338 (0x152), region = 44 }
   0xf   : > { %s2247_s23 = sshll.u32 %s4186_s22, 3  ;;  %v3273_v0 = vld [vmem:[%s4176_s1] sm:$0xf] (%p259_p4)  ;;  %v3278_v1 = vld [vmem:[%s4176_s1 + $0x4] sm:$0xf] (%p259_p4)  ;;  %v3210_v2 = vmov (%p259_p4), 0  }
  0x10   : > { %s3268_s26 = scalar_lea.vmem %s4180_s5, %s2247_s23  ;;  %264 = vst [vmem:[#allocation2] sm:$0xff] (%p259_p4), %v3210_v2  ;;  %265 = vst [vmem:[#allocation2 + $0x8] sm:$0xff] (%p259_p4), %v3210_v2  ;;  %v3397_v3 = vld [vmem:[%s4176_s1 + $0x8] sm:$0xf] (%p259_p4)  ;;  %v3402_v4 = vld [vmem:[%s4176_s1 + $0xc] sm:$0xf] (%p259_p4) }
  0x11   : > { %266 = vst [vmem:[#allocation2 + $0x10] sm:$0xff] (%p259_p4), %v3210_v2  ;;  %267 = vst [vmem:[#allocation2 + $0x18] sm:$0xff] (%p259_p4), %v3210_v2  ;;  %v3407_v5 = vld [vmem:[%s4176_s1 + $0x10] sm:$0xf] (%p259_p4)  ;;  %v3412_v6 = vld [vmem:[%s4176_s1 + $0x14] sm:$0xf] (%p259_p4) }
  0x12   : > { %268 = vst [vmem:[#allocation2 + $0x20] sm:$0xff] (%p259_p4), %v3210_v2  ;;  %269 = vst [vmem:[#allocation2 + $0x28] sm:$0xff] (%p259_p4), %v3210_v2  ;;  %v3417_v7 = vld [vmem:[%s4176_s1 + $0x18] sm:$0xf] (%p259_p4)  ;;  %v3422_v8 = vld [vmem:[%s4176_s1 + $0x1c] sm:$0xf] (%p259_p4) }
  0x13   : > { %270 = vst [vmem:[#allocation2 + $0x30] sm:$0xff] (%p259_p4), %v3210_v2  ;;  %271 = vst [vmem:[#allocation2 + $0x38] sm:$0xff] (%p259_p4), %v3210_v2  ;;  %v3427_v9 = vld [vmem:[%s4176_s1 + $0x20] sm:$0xf] (%p259_p4)  ;;  %v3432_v10 = vld [vmem:[%s4176_s1 + $0x24] sm:$0xf] (%p259_p4) }
  0x14   : > { %272 = vst [vmem:[#allocation2 + $0x40] sm:$0xff] (%p259_p4), %v3210_v2  ;;  %273 = vst [vmem:[#allocation2 + $0x48] sm:$0xff] (%p259_p4), %v3210_v2  ;;  %v3437_v11 = vld [vmem:[%s4176_s1 + $0x28] sm:$0xf] (%p259_p4)  ;;  %v3442_v12 = vld [vmem:[%s4176_s1 + $0x2c] sm:$0xf] (%p259_p4) }
  0x15   : > { %274 = vst [vmem:[#allocation2 + $0x50] sm:$0xff] %v3210_v2  ;;  %275 = vst [vmem:[#allocation2 + $0x58] sm:$0xff] %v3210_v2  ;;  %v3447_v13 = vld [vmem:[%s4176_s1 + $0x30] sm:$0xf]  ;;  %v3452_v14 = vld [vmem:[%s4176_s1 + $0x34] sm:$0xf] }
  0x16   : > { %276 = vst [vmem:[#allocation2 + $0x60] sm:$0xff] %v3210_v2  ;;  %277 = vst [vmem:[#allocation2 + $0x68] sm:$0xff] %v3210_v2  ;;  %v3457_v15 = vld [vmem:[%s4176_s1 + $0x38] sm:$0xf]  ;;  %v3462_v16 = vld [vmem:[%s4176_s1 + $0x3c] sm:$0xf] }
  0x17   : > { %278 = vst [vmem:[#allocation2 + $0x70] sm:$0xff] %v3210_v2  ;;  %279 = vst [vmem:[#allocation2 + $0x78] sm:$0xff] %v3210_v2  ;;  %v3467_v17 = vld [vmem:[%s4177_s2] ss:$0 sm:$0xff]  ;;  %s3469_s16 = smov 0  }
  0x18   : > { %280 = vst [vmem:[#allocation2 + $0x80] sm:$0xff] %v3210_v2  ;;  %281 = vst [vmem:[#allocation2 + $0x88] sm:$0xff] %v3210_v2 }
  0x19   : > { %282 = vst [vmem:[#allocation2 + $0x90] sm:$0xff] %v3210_v2  ;;  %283 = vst [vmem:[#allocation2 + $0x98] sm:$0xff] %v3210_v2 }
  0x1a   : > { %284 = vst [vmem:[#allocation2 + $0xa0] sm:$0xff] %v3210_v2  ;;  %285 = vst [vmem:[#allocation2 + $0xa8] sm:$0xff] %v3210_v2 }
  0x1b   : > { %286 = vst [vmem:[#allocation2 + $0xb0] sm:$0xff] %v3210_v2  ;;  %287 = vst [vmem:[#allocation2 + $0xb8] sm:$0xff] %v3210_v2 }
  0x1c   : > { %288 = vst [vmem:[#allocation2 + $0xc0] sm:$0xff] %v3210_v2  ;;  %289 = vst [vmem:[#allocation2 + $0xc8] sm:$0xff] %v3210_v2 }
  0x1d   : > { %290 = vst [vmem:[#allocation2 + $0xd0] sm:$0xff] %v3210_v2  ;;  %291 = vst [vmem:[#allocation2 + $0xd8] sm:$0xff] %v3210_v2 }
  0x1e   : > { %292 = vst [vmem:[#allocation2 + $0xe0] sm:$0xff] %v3210_v2  ;;  %293 = vst [vmem:[#allocation2 + $0xe8] sm:$0xff] %v3210_v2 }
  0x1f   : > { %294 = vst [vmem:[#allocation2 + $0xf0] sm:$0xff] %v3210_v2  ;;  %295 = vst [vmem:[#allocation2 + $0xf8] sm:$0xff] %v3210_v2 }
  0x20   : > { %296 = vst [vmem:[#allocation2 + $0x100] sm:$0xff] %v3210_v2  ;;  %297 = vst [vmem:[#allocation2 + $0x108] sm:$0xff] %v3210_v2 }
  0x21   : > { %298 = vst [vmem:[#allocation2 + $0x110] sm:$0xff] %v3210_v2  ;;  %299 = vst [vmem:[#allocation2 + $0x118] sm:$0xff] %v3210_v2 }
  0x22   : > { %300 = vst [vmem:[#allocation2 + $0x120] sm:$0xff] %v3210_v2  ;;  %301 = vst [vmem:[#allocation2 + $0x128] sm:$0xff] %v3210_v2 }
  0x23   : > { %302 = vst [vmem:[#allocation2 + $0x130] sm:$0xff] %v3210_v2  ;;  %303 = vst [vmem:[#allocation2 + $0x138] sm:$0xff] %v3210_v2 }
  0x24   : > { %304 = vst [vmem:[#allocation2 + $0x140] sm:$0xff] %v3210_v2  ;;  %305 = vst [vmem:[#allocation2 + $0x148] sm:$0xff] %v3210_v2 }
  0x25   : > { %306 = vst [vmem:[#allocation2 + $0x150] sm:$0xff] %v3210_v2  ;;  %307 = vst [vmem:[#allocation2 + $0x158] sm:$0xff] %v3210_v2 }
  0x26   : > { %308 = vst [vmem:[#allocation2 + $0x160] sm:$0xff] %v3210_v2  ;;  %309 = vst [vmem:[#allocation2 + $0x168] sm:$0xff] %v3210_v2 }
  0x27   : > { %310 = vst [vmem:[#allocation2 + $0x170] sm:$0xff] %v3210_v2  ;;  %311 = vst [vmem:[#allocation2 + $0x178] sm:$0xff] %v3210_v2 }
  0x28   : > { %312 = vst [vmem:[#allocation2 + $0x180] sm:$0xff] %v3210_v2  ;;  %313 = vst [vmem:[#allocation2 + $0x188] sm:$0xff] %v3210_v2 }
  0x29   : > { %314 = vst [vmem:[#allocation2 + $0x190] sm:$0xff] %v3210_v2  ;;  %315 = vst [vmem:[#allocation2 + $0x198] sm:$0xff] %v3210_v2 }
  0x2a   : > { %316 = vst [vmem:[#allocation2 + $0x1a0] sm:$0xff] %v3210_v2  ;;  %317 = vst [vmem:[#allocation2 + $0x1a8] sm:$0xff] %v3210_v2 }
  0x2b   : > { %318 = vst [vmem:[#allocation2 + $0x1b0] sm:$0xff] %v3210_v2  ;;  %319 = vst [vmem:[#allocation2 + $0x1b8] sm:$0xff] %v3210_v2 }
  0x2c   : > { %320 = vst [vmem:[#allocation2 + $0x1c0] sm:$0xff] %v3210_v2  ;;  %321 = vst [vmem:[#allocation2 + $0x1c8] sm:$0xff] %v3210_v2 }
  0x2d   : > { %322 = vst [vmem:[#allocation2 + $0x1d0] sm:$0xff] %v3210_v2  ;;  %323 = vst [vmem:[#allocation2 + $0x1d8] sm:$0xff] %v3210_v2 }
  0x2e   : > { %324 = vst [vmem:[#allocation2 + $0x1e0] sm:$0xff] %v3210_v2  ;;  %325 = vst [vmem:[#allocation2 + $0x1e8] sm:$0xff] %v3210_v2 }
  0x2f   : > { %326 = vst [vmem:[#allocation2 + $0x1f0] sm:$0xff] %v3210_v2  ;;  %327 = vst [vmem:[#allocation2 + $0x1f8] sm:$0xff] %v3210_v2 }
  0x30   : > { %328 = vst [vmem:[#allocation2 + $0x200] sm:$0xff] %v3210_v2  ;;  %329 = vst [vmem:[#allocation2 + $0x208] sm:$0xff] %v3210_v2 }
  0x31   : > { %330 = vst [vmem:[#allocation2 + $0x210] sm:$0xff] %v3210_v2  ;;  %331 = vst [vmem:[#allocation2 + $0x218] sm:$0xff] %v3210_v2 }
  0x32   : > { %332 = vst [vmem:[#allocation2 + $0x220] sm:$0xff] %v3210_v2  ;;  %333 = vst [vmem:[#allocation2 + $0x228] sm:$0xff] %v3210_v2 }
  0x33   : > { %334 = vst [vmem:[#allocation2 + $0x230] sm:$0xff] %v3210_v2  ;;  %335 = vst [vmem:[#allocation2 + $0x238] sm:$0xff] %v3210_v2 }
  0x34   : > { %336 = vst [vmem:[#allocation2 + $0x240] sm:$0xff] %v3210_v2  ;;  %337 = vst [vmem:[#allocation2 + $0x248] sm:$0xff] %v3210_v2 }
  0x35   : > { %338 = vst [vmem:[#allocation2 + $0x250] sm:$0xff] %v3210_v2  ;;  %339 = vst [vmem:[#allocation2 + $0x258] sm:$0xff] %v3210_v2 }
  0x36   : > { %340 = vst [vmem:[#allocation2 + $0x260] sm:$0xff] %v3210_v2  ;;  %341 = vst [vmem:[#allocation2 + $0x268] sm:$0xff] %v3210_v2 }
  0x37   : > { %342 = vst [vmem:[#allocation2 + $0x270] sm:$0xff] %v3210_v2  ;;  %343 = vst [vmem:[#allocation2 + $0x278] sm:$0xff] %v3210_v2 }
  0x38   : > { %344 = vst [vmem:[#allocation2 + $0x280] sm:$0xff] %v3210_v2  ;;  %345 = vst [vmem:[#allocation2 + $0x288] sm:$0xff] %v3210_v2 }
  0x39   : > { %346 = vst [vmem:[#allocation2 + $0x290] sm:$0xff] %v3210_v2  ;;  %347 = vst [vmem:[#allocation2 + $0x298] sm:$0xff] %v3210_v2 }
  0x3a   : > { %348 = vst [vmem:[#allocation2 + $0x2a0] sm:$0xff] %v3210_v2  ;;  %349 = vst [vmem:[#allocation2 + $0x2a8] sm:$0xff] %v3210_v2 }
  0x3b   : > { %350 = vst [vmem:[#allocation2 + $0x2b0] sm:$0xff] %v3210_v2  ;;  %351 = vst [vmem:[#allocation2 + $0x2b8] sm:$0xff] %v3210_v2 }
  0x3c   : > { %352 = vst [vmem:[#allocation2 + $0x2c0] sm:$0xff] %v3210_v2  ;;  %353 = vst [vmem:[#allocation2 + $0x2c8] sm:$0xff] %v3210_v2 }
  0x3d   : > { %354 = vst [vmem:[#allocation2 + $0x2d0] sm:$0xff] %v3210_v2  ;;  %355 = vst [vmem:[#allocation2 + $0x2d8] sm:$0xff] %v3210_v2 }
  0x3e   : > { %356 = vst [vmem:[#allocation2 + $0x2e0] sm:$0xff] %v3210_v2  ;;  %357 = vst [vmem:[#allocation2 + $0x2e8] sm:$0xff] %v3210_v2 }
  0x3f   : > { %358 = vst [vmem:[#allocation2 + $0x2f0] sm:$0xff] %v3210_v2  ;;  %359 = vst [vmem:[#allocation2 + $0x2f8] sm:$0xff] %v3210_v2 }
  0x40   : > { %360 = vst [vmem:[#allocation2 + $0x300] sm:$0xff] %v3210_v2  ;;  %361 = vst [vmem:[#allocation2 + $0x308] sm:$0xff] %v3210_v2 }
  0x41   : > { %362 = vst [vmem:[#allocation2 + $0x310] sm:$0xff] %v3210_v2  ;;  %363 = vst [vmem:[#allocation2 + $0x318] sm:$0xff] %v3210_v2 }
  0x42   : > { %364 = vst [vmem:[#allocation2 + $0x320] sm:$0xff] %v3210_v2  ;;  %365 = vst [vmem:[#allocation2 + $0x328] sm:$0xff] %v3210_v2 }
  0x43   : > { %366 = vst [vmem:[#allocation2 + $0x330] sm:$0xff] %v3210_v2  ;;  %367 = vst [vmem:[#allocation2 + $0x338] sm:$0xff] %v3210_v2 }
  0x44   : > { %368 = vst [vmem:[#allocation2 + $0x340] sm:$0xff] %v3210_v2  ;;  %369 = vst [vmem:[#allocation2 + $0x348] sm:$0xff] %v3210_v2 }
  0x45   : > { %370 = vst [vmem:[#allocation2 + $0x350] sm:$0xff] %v3210_v2  ;;  %371 = vst [vmem:[#allocation2 + $0x358] sm:$0xff] %v3210_v2 }
  0x46   : > { %372 = vst [vmem:[#allocation2 + $0x360] sm:$0xff] %v3210_v2  ;;  %373 = vst [vmem:[#allocation2 + $0x368] sm:$0xff] %v3210_v2 }
  0x47   : > { %374 = vst [vmem:[#allocation2 + $0x370] sm:$0xff] %v3210_v2  ;;  %375 = vst [vmem:[#allocation2 + $0x378] sm:$0xff] %v3210_v2 }
  0x48   : > { %376 = vst [vmem:[#allocation2 + $0x380] sm:$0xff] %v3210_v2  ;;  %377 = vst [vmem:[#allocation2 + $0x388] sm:$0xff] %v3210_v2 }
  0x49 LB: >> { %s3474_s17 = smov 0   ;;  %s3204_s16 = sphi %s3469_s16, %s400_s16  }
  0x4a LB: >>> { %v2254_v18 = vcombine.low %v3273_v0, %v3278_v1  ;;  %s2249_s22 = sshll.u32 %s3204_s16, 4  ;;  %v3211_v19 = vmov 0.0   ;;  %v2255_v20 = vcombine.low %v3397_v3, %v3402_v4  ;;  %vm3212_vm0 = vmmov 0   ;;  %s535_s6 = smul.u32 18, %s3204_s16  ;;  %s3208_s17 = sphi %s3474_s17, %s406_s17  }
  0x4b   : >>> { %2778 = vmatprep.subr.bf16.mxu0 %v3211_v19  ;;  %s408_s23 = sadd.s32 %s3208_s17, %s2249_s22  ;;  %2794 = vmatprep.mubr.msk.bf16.mxu0 %vm3212_vm0, %v3211_v19  ;;  %v2256_v21 = vcombine.low %v3407_v5, %v3412_v6  ;;  %v2257_v22 = vcombine.low %v3417_v7, %v3422_v8  ;;  %v2258_v23 = vcombine.low %v3427_v9, %v3432_v10  ;;  %vm521_vm1 = vcmask 1040384  }
  0x4c   : >>> { %2779 = vmatpush3.bf16.msra.mxu0 %v2254_v18  ;;  %s2250_s24 = sshll.u32 %s408_s23, 4  ;;  %v2259_v24 = vcombine.low %v3437_v11, %v3442_v12  ;;  %v2260_v25 = vcombine.low %v3447_v13, %v3452_v14  ;;  %v2261_v26 = vcombine.low %v3457_v15, %v3462_v16  ;;  %s536_s7 = sadd.s32 %s3208_s17, %s535_s6  ;;  %vm528_vm2 = vcmask 1046528  }
  0x4d   : >>> { %2780 = vmatprep.subr.bf16.mxu0 %v3211_v19  ;;  %s410_s25 = sshra.s32 %s2250_s24, 3  ;;  %s2439_s8 = sshll.u32 %s536_s7, 4 }
  0x4e   : >>> { %s2251_s27 = sshll.u32 %s410_s25, 2  ;;  %s2440_s9 = sadd.s32 16, %s2439_s8 }
  0x4f   : >>> { %s413_s30 = scalar_lea.vmem %s4175_s0, %s2251_s27  ;;  %s542_s10 = sshra.s32 %s2440_s9, 4 }
  0x50   : >>> { %2781 = vmatpush3.bf16.msra.mxu0 %v2255_v20  ;;  %v3097_v27 = vld [vmem:[%s413_s30] sm:$0xff]   ;;  %s2441_s11 = smul.u32 24, %s542_s10  ;;  %s406_s17 = sadd.s32 1, %s3208_s17  }
  0x51   : >>> { %2782 = vmatprep.subr.bf16.mxu0 %v3211_v19  ;;  %p403_p6 = scmp.ge.s32.totalorder %s406_s17, 16  }
  0x52   : >>> { %s546_s12 = scalar_lea.vmem [#allocation2], %s2441_s11  ;;  %s400_s16 = sadd.s32 (%p403_p6), 1, %s3204_s16  }
  0x53   : >> { %p397_p7 = scmp.ge.s32.totalorder (%p403_p6), %s400_s16, 2  }
  0x54   : >>> { %2783 = vmatpush3.bf16.msra.mxu0 %v2256_v21 }
  0x55   : >>> { %2784 = vmatprep.subr.bf16.mxu0 %v3211_v19 }
  0x58   : >>> { %2785 = vmatpush3.bf16.msra.mxu0 %v2257_v22 }
  0x59   : >>> { %2786 = vmatprep.subr.bf16.mxu0 %v3211_v19 }
  0x5c   : >>> { %2787 = vmatpush3.bf16.msra.mxu0 %v2258_v23 }
  0x5d   : >>> { %2788 = vmatprep.subr.bf16.mxu0 %v3211_v19 }
  0x60   : >>> { %2789 = vmatpush3.bf16.msra.mxu0 %v2259_v24 }
  0x61   : >>> { %2790 = vmatprep.subr.bf16.mxu0 %v3211_v19 }
  0x64   : >>> { %2791 = vmatpush3.bf16.msra.mxu0 %v2260_v25 }
  0x65   : >>> { %2792 = vmatprep.subr.bf16.mxu0 %v3211_v19 }
  0x68   : >>> { %2793 = vmatpush3.bf16.msra.mxu0 %v2261_v26 }
  0x6b   : >>> { %2795 = vmatmul.mubr.bf16.vlgmr.msra.gmra.mrb[0].mxu0 %v3097_v27 }
 0x13e   : >>> { %v510_v28 = vpop.f32.mrb[0].mxu0 }
 0x13f   : >>> { %v511_v29 = vadd.f32 %v3467_v17, %v510_v28  ;;  %v2796_v30 = vpop.f32.mrb[1].mxu0 }
 0x140   : >>> { %v513_v31 = vpop.f32.mrb[2].mxu0 }
 0x141   : >>> { %v517_v32 = vmax.f32 %v511_v29, 0.0  ;;  %v514_v33 = vadd.f32 %v3467_v17, %v513_v31  ;;  %v2797_v34 = vpop.f32.mrb[3].mxu0 }
 0x143   : >>> { %v522_v35 = vrot.slane %v517_v32, 7  ;;  %v518_v36 = vmax.f32 %v514_v33, 0.0  ;;  %v529_v37 = vrot.slane %v517_v32, 1 }
 0x144   : >> { %405 = sbr.rel (!%p403_p6) target bundleno = 74 (0x4a), region = 98 }
 0x145   : >>> { %v523_v38 = vrot.slane %v518_v36, 7  ;;  %v530_v39 = vrot.slane %v518_v36, 1  ;;  %v540_v40 = vpack.c.bf16 %v518_v36, %v517_v32  ;;  %v527_v41 = vsel %vm521_vm1, 0.0, %v522_v35 }
 0x147   : >>> { %v524_v42 = vsel %vm521_vm1, %v522_v35, %v523_v38  ;;  %v531_v43 = vsel %vm528_vm2, %v529_v37, %v530_v39  ;;  %v534_v44 = vsel %vm528_vm2, %v530_v39, 0.0  ;;  %548 = vst [vmem:[%s546_s12 + $0x8] sm:$0xff] %v540_v40 }
 0x148   : >>> { %v539_v45 = vpack.c.bf16 %v524_v42, %v527_v41  ;;  %v541_v46 = vpack.c.bf16 %v534_v44, %v531_v43 }
 0x14a   : >>> { %547 = vst [vmem:[%s546_s12] sm:$0xff] %v539_v45  ;;  %549 = vst [vmem:[%s546_s12 + $0x10] sm:$0xff] %v541_v46 }
 0x14b   : > { %399 = sbr.rel (!%p397_p7) target bundleno = 73 (0x49), region = 109 }
 0x152 PF: > { %v3098_v47 = vld [vmem:[%s4178_s3 + $0x100] sm:$0xff]   ;;  %v3101_v50 = vld [vmem:[%s4178_s3 + $0x108] sm:$0xff]   ;;  %v3104_v53 = vld [vmem:[%s4178_s3 + $0x110] sm:$0xff]   ;;  %s3535_s9 = smul.u32 192, %s3192_s18 }
 0x153   : > { %v3099_v48 = vld [vmem:[%s4178_s3 + $0x140] sm:$0xff]   ;;  %2454 = vmatprep.subr.bf16.mxu0 %v3098_v47  ;;  %v3102_v51 = vld [vmem:[%s4178_s3 + $0x148] sm:$0xff]   ;;  %v3105_v54 = vld [vmem:[%s4178_s3 + $0x150] sm:$0xff]  }
 0x154   : > { %v3100_v49 = vld [vmem:[%s4178_s3 + $0xc0] sm:$0xff]   ;;  %2798 = vmatprep.subr.bf16.mxu1 %v3099_v48  ;;  %v3103_v52 = vld [vmem:[%s4178_s3 + $0xc8] sm:$0xff]   ;;  %v3106_v55 = vld [vmem:[%s4178_s3 + $0xd0] sm:$0xff]   ;;  %s640_s23 = sadd.s32 16, %s3535_s9  ;;  %s551_s24 = sshra.s32 %s3535_s9, 4 }
 0x155   : > { %2455 = vmatpush3.bf16.msra.mxu0 %v3100_v49  ;;  %2799 = vmatpush3.bf16.msra.mxu1 %v3099_v48  ;;  %v3107_v56 = vld [vmem:[%s4178_s3 + $0x118] sm:$0xff]   ;;  %v3110_v59 = vld [vmem:[%s4178_s3 + $0x120] sm:$0xff]   ;;  %s641_s27 = sshra.s32 %s640_s23, 4  ;;  %v3113_v62 = vld [vmem:[%s4178_s3 + $0x128] sm:$0xff]   ;;  %s2442_s7 = smul.u32 24, %s551_s24 }
 0x156   : > { %2456 = vmatprep.subr.bf16.mxu0 %v3101_v50  ;;  %2800 = vmatprep.subr.bf16.mxu1 %v3102_v51  ;;  %v3108_v57 = vld [vmem:[%s4178_s3 + $0x158] sm:$0xff]   ;;  %v3111_v60 = vld [vmem:[%s4178_s3 + $0x160] sm:$0xff]   ;;  %v3114_v63 = vld [vmem:[%s4178_s3 + $0x168] sm:$0xff]   ;;  %s2443_s10 = smul.u32 24, %s641_s27  ;;  %s1535_s22 = sadd.s32 32, %s3535_s9 }
 0x157   : > { %v3109_v58 = vld [vmem:[%s4178_s3 + $0xd8] sm:$0xff]   ;;  %v3112_v61 = vld [vmem:[%s4178_s3 + $0xe0] sm:$0xff]   ;;  %v3115_v0 = vld [vmem:[%s4178_s3 + $0xe8] sm:$0xff]   ;;  %s3707_s13 = scalar_lea.vmem [#allocation2], %s2442_s7  ;;  %s1536_s18 = sshra.s32 %s1535_s22, 4 }
 0x158   : > { %v3116_v1 = vld [vmem:[%s4178_s3 + $0x130] sm:$0xff]   ;;  %v3119_v4 = vld [vmem:[%s4178_s3 + $0x138] sm:$0xff]   ;;  %s3580_s25 = scalar_lea.vmem [#allocation2], %s2443_s10  ;;  %v3122_v9 = vld [vmem:[%s4178_s3 + $0x40] sm:$0xff]   ;;  %s2444_s23 = smul.u32 24, %s1536_s18 }
 0x159   : > { %2457 = vmatpush3.bf16.msra.mxu0 %v3103_v52  ;;  %2801 = vmatpush3.bf16.msra.mxu1 %v3102_v51  ;;  %v3117_v2 = vld [vmem:[%s4178_s3 + $0x170] sm:$0xff]   ;;  %v647_v5 = vld [vmem:[%s3580_s25 + $0x8] sm:$0xff]  ;;  %v3120_v7 = vld [vmem:[%s4178_s3 + $0x178] sm:$0xff]  }
 0x15a   : > { %2458 = vmatprep.subr.bf16.mxu0 %v3104_v53  ;;  %2802 = vmatprep.subr.bf16.mxu1 %v3105_v54  ;;  %v3118_v3 = vld [vmem:[%s4178_s3 + $0xf0] sm:$0xff]   ;;  %v3121_v8 = vld [vmem:[%s4178_s3 + $0xf8] sm:$0xff]   ;;  %v3123_v10 = vld [vmem:[%s4178_s3 + $0x1c0] sm:$0xff]   ;;  %s3768_s9 = scalar_lea.vmem [#allocation2], %s2444_s23 }
 0x15b   : > { %v648_v6 = vld [vmem:[%s3580_s25 + $0x10] sm:$0xff]  ;;  %907 = vmatprep.mubr.bf16.mxu0 %v647_v5  ;;  %v646_v11 = vld [vmem:[%s3580_s25] sm:$0xff]  ;;  %v651_v12 = vld [vmem:[%s3580_s25 + $0x28] sm:$0xff] }
 0x15c   : > { %2814 = vmatprep.mubr.bf16.mxu1 %v648_v6  ;;  %v3124_v13 = vld [vmem:[%s4178_s3] sm:$0xff]   ;;  %v3126_v15 = vld [vmem:[%s4178_s3 + $0x48] sm:$0xff]   ;;  %v3128_v21 = vld [vmem:[%s4178_s3 + $0x50] sm:$0xff]  }
 0x15d   : > { %2459 = vmatpush3.bf16.msra.mxu0 %v3106_v55  ;;  %2803 = vmatpush3.bf16.msra.mxu1 %v3105_v54  ;;  %v3125_v14 = vld [vmem:[%s4178_s3 + $0x180] sm:$0xff]   ;;  %v3129_v17 = vld [vmem:[%s4178_s3 + $0x1c8] sm:$0xff]   ;;  %v649_v22 = vld [vmem:[%s3580_s25 + $0x18] sm:$0xff] }
 0x15e   : > { %2460 = vmatprep.subr.bf16.mxu0 %v3107_v56  ;;  %2804 = vmatprep.subr.bf16.mxu1 %v3108_v57  ;;  %v650_v16 = vld [vmem:[%s3580_s25 + $0x20] sm:$0xff]  ;;  %v3127_v19 = vld [vmem:[%s4178_s3 + $0x8] sm:$0xff]   ;;  %v657_v23 = vld [vmem:[%s3580_s25 + $0x58] sm:$0xff] }
 0x15f   : > { %v654_v18 = vld [vmem:[%s3580_s25 + $0x40] sm:$0xff]  ;;  %v3131_v20 = vld [vmem:[%s4178_s3 + $0x188] sm:$0xff]   ;;  %v3130_v24 = vld [vmem:[%s4178_s3 + $0x10] sm:$0xff]  }
 0x160   : > { %v653_v25 = vld [vmem:[%s3580_s25 + $0x38] sm:$0xff]  ;;  %v660_v26 = vld [vmem:[%s3580_s25 + $0x70] sm:$0xff]  ;;  %v3134_v30 = vld [vmem:[%s4178_s3 + $0x60] sm:$0xff]  }
 0x161   : > { %2461 = vmatpush3.bf16.msra.mxu0 %v3109_v58  ;;  %2805 = vmatpush3.bf16.msra.mxu1 %v3108_v57  ;;  %v3132_v27 = vld [vmem:[%s4178_s3 + $0x58] sm:$0xff]   ;;  %v3135_v29 = vld [vmem:[%s4178_s3 + $0x1d0] sm:$0xff]   ;;  %v663_v33 = vld [vmem:[%s3580_s25 + $0x88] sm:$0xff] }
 0x162   : > { %2462 = vmatprep.subr.bf16.mxu0 %v3110_v59  ;;  %2806 = vmatprep.subr.bf16.mxu1 %v3111_v60  ;;  %v3133_v28 = vld [vmem:[%s4178_s3 + $0x18] sm:$0xff]   ;;  %v3137_v31 = vld [vmem:[%s4178_s3 + $0x190] sm:$0xff]   ;;  %v666_v35 = vld [vmem:[%s3580_s25 + $0xa0] sm:$0xff] }
 0x163   : > { %v652_v32 = vld [vmem:[%s3580_s25 + $0x30] sm:$0xff]  ;;  %v3136_v36 = vld [vmem:[%s4178_s3 + $0x20] sm:$0xff]   ;;  %v3138_v37 = vld [vmem:[%s4178_s3 + $0x68] sm:$0xff]  }
 0x164   : > { %v656_v34 = vld [vmem:[%s3580_s25 + $0x50] sm:$0xff]  ;;  %v3141_v38 = vld [vmem:[%s4178_s3 + $0x1d8] sm:$0xff]   ;;  %v3139_v40 = vld [vmem:[%s4178_s3 + $0x28] sm:$0xff]  }
 0x165   : > { %2463 = vmatpush3.bf16.msra.mxu0 %v3112_v61  ;;  %2807 = vmatpush3.bf16.msra.mxu1 %v3111_v60  ;;  %v3143_v39 = vld [vmem:[%s4178_s3 + $0x198] sm:$0xff]   ;;  %v3140_v41 = vld [vmem:[%s4178_s3 + $0x70] sm:$0xff]   ;;  %v655_v42 = vld [vmem:[%s3580_s25 + $0x48] sm:$0xff] }
 0x166   : > { %2464 = vmatprep.subr.bf16.mxu0 %v3113_v62  ;;  %2808 = vmatprep.subr.bf16.mxu1 %v3114_v63  ;;  %v669_v43 = vld [vmem:[%s3580_s25 + $0xb8] sm:$0xff]  ;;  %v659_v44 = vld [vmem:[%s3580_s25 + $0x68] sm:$0xff]  ;;  %v672_v45 = vld [vmem:[%s3580_s25 + $0xd0] sm:$0xff] }
 0x167   : > { %v3142_v46 = vld [vmem:[%s4178_s3 + $0x30] sm:$0xff]   ;;  %v3144_v47 = vld [vmem:[%s4178_s3 + $0x78] sm:$0xff]   ;;  %v3147_v48 = vld [vmem:[%s4178_s3 + $0x1e0] sm:$0xff]  }
 0x168   : > { %v3148_v49 = vld [vmem:[%s4178_s3 + $0x1a0] sm:$0xff]   ;;  %v3145_v50 = vld [vmem:[%s4178_s3 + $0x38] sm:$0xff]   ;;  %v3150_v53 = vld [vmem:[%s4178_s3 + $0x1e8] sm:$0xff]  }
 0x169   : > { %2465 = vmatpush3.bf16.msra.mxu0 %v3115_v0  ;;  %2809 = vmatpush3.bf16.msra.mxu1 %v3114_v63  ;;  %v658_v51 = vld [vmem:[%s3580_s25 + $0x60] sm:$0xff]  ;;  %v675_v54 = vld [vmem:[%s3580_s25 + $0xe8] sm:$0xff]  ;;  %v3153_v58 = vld [vmem:[%s4178_s3 + $0x1f0] sm:$0xff]  }
 0x16a   : > { %2466 = vmatprep.subr.bf16.mxu0 %v3116_v1  ;;  %2810 = vmatprep.subr.bf16.mxu1 %v3117_v2  ;;  %v3146_v52 = vld [vmem:[%s4178_s3 + $0x80] sm:$0xff]   ;;  %v3151_v55 = vld [vmem:[%s4178_s3 + $0x1a8] sm:$0xff]   ;;  %v661_v59 = vld [vmem:[%s3580_s25 + $0x78] sm:$0xff] }
 0x16b   : > { %v662_v56 = vld [vmem:[%s3580_s25 + $0x80] sm:$0xff]  ;;  %v3154_v60 = vld [vmem:[%s4178_s3 + $0x1b0] sm:$0xff]   ;;  %v681_v61 = vld [vmem:[%s3580_s25 + $0x118] sm:$0xff] }
 0x16c   : > { %v678_v57 = vld [vmem:[%s3580_s25 + $0x100] sm:$0xff]  ;;  %v665_v62 = vld [vmem:[%s3580_s25 + $0x98] sm:$0xff]  ;;  %v557_v63 = vld [vmem:[%s3707_s13 + $0x8] sm:$0xff] }
 0x16d   : > { %2467 = vmatpush3.bf16.msra.mxu0 %v3118_v3  ;;  %2811 = vmatpush3.bf16.msra.mxu1 %v3117_v2  ;;  %v3156_v0 = vld [vmem:[%s4178_s3 + $0x1f8] sm:$0xff]   ;;  %v664_v2 = vld [vmem:[%s3580_s25 + $0x90] sm:$0xff]  ;;  %v3720_v3 = vld [vmem:[%s4178_s3 + $0x200] sm:$0xff]  }
 0x16e   : > { %2468 = vmatprep.subr.bf16.mxu0 %v3119_v4  ;;  %2812 = vmatprep.subr.bf16.mxu1 %v3120_v7  ;;  %v3157_v1 = vld [vmem:[%s4178_s3 + $0x1b8] sm:$0xff]   ;;  %v556_v4 = vld [vmem:[%s3707_s13] sm:$0xff]  ;;  %v668_v5 = vld [vmem:[%s3580_s25 + $0xb0] sm:$0xff] }
 0x16f   : > { %v3149_v6 = vld [vmem:[%s4178_s3 + $0x88] sm:$0xff]  }
 0x171   : > { %2469 = vmatpush3.bf16.msra.mxu0 %v3121_v8  ;;  %2813 = vmatpush3.bf16.msra.mxu1 %v3120_v7  ;;  %v560_v7 = vld [vmem:[%s3707_s13 + $0x20] sm:$0xff]  ;;  %v3152_v8 = vld [vmem:[%s4178_s3 + $0x90] sm:$0xff]  }
 0x172   : > { %2562 = vmatprep.subr.bf16.mxu1 %v3122_v9  ;;  %2670 = vmatprep.subr.bf16.mxu0 %v3123_v10  ;;  %v667_v9 = vld [vmem:[%s3580_s25 + $0xa8] sm:$0xff]  ;;  %v559_v10 = vld [vmem:[%s3707_s13 + $0x18] sm:$0xff] }
 0x174   : > { %908 = vmatmul.mubr.bf16.vlgmr.msra.gmra.mrb[0].mxu0 %v646_v11  ;;  %2815 = vmatmul.mubr.bf16.vlgmr.msra.gmra.mrb[0].mxu1 %v651_v12  ;;  %v671_v11 = vld [vmem:[%s3580_s25 + $0xc8] sm:$0xff]  ;;  %v563_v12 = vld [vmem:[%s3707_s13 + $0x38] sm:$0xff] }
 0x175   : > { %2563 = vmatpush3.bf16.msra.mxu1 %v3124_v13  ;;  %2671 = vmatpush3.bf16.msra.mxu0 %v3125_v14  ;;  %v3155_v13 = vld [vmem:[%s4178_s3 + $0x98] sm:$0xff]   ;;  %v3158_v14 = vld [vmem:[%s4178_s3 + $0xa0] sm:$0xff]  }
 0x176   : > { %2564 = vmatprep.subr.bf16.mxu1 %v3126_v15  ;;  %915 = vmatprep.mubr.bf16.mxu0 %v650_v16  ;;  %v670_v15 = vld [vmem:[%s3580_s25 + $0xc0] sm:$0xff]  ;;  %v562_v16 = vld [vmem:[%s3707_s13 + $0x30] sm:$0xff] }
 0x177   : > { %2818 = vmatprep.mubr.bf16.mxu1 %v654_v18  ;;  %2672 = vmatprep.subr.bf16.mxu0 %v3129_v17  ;;  %v674_v17 = vld [vmem:[%s3580_s25 + $0xe0] sm:$0xff]  ;;  %v566_v18 = vld [vmem:[%s3707_s13 + $0x50] sm:$0xff] }
 0x179   : > { %2565 = vmatpush3.bf16.msra.mxu1 %v3127_v19  ;;  %2673 = vmatpush3.bf16.msra.mxu0 %v3131_v20  ;;  %v3160_v19 = vld [vmem:[%s4178_s3 + $0xa8] sm:$0xff]   ;;  %v3162_v20 = vld [vmem:[%s4178_s3 + $0xb0] sm:$0xff]  }
 0x17a   : > { %2566 = vmatprep.subr.bf16.mxu1 %v3128_v21  ;;  %2674 = vmatprep.subr.bf16.mxu0 %v3135_v29  ;;  %v673_v21 = vld [vmem:[%s3580_s25 + $0xd8] sm:$0xff]  ;;  %v572_v29 = vld [vmem:[%s3707_s13 + $0x80] sm:$0xff] }
 0x17c   : > { %916 = vmatmul.mubr.bf16.gmra.mrb[4].mxu0 %v649_v22  ;;  %2819 = vmatmul.mubr.bf16.gmra.mrb[4].mxu1 %v657_v23  ;;  %v565_v22 = vld [vmem:[%s3707_s13 + $0x48] sm:$0xff]  ;;  %v677_v23 = vld [vmem:[%s3580_s25 + $0xf8] sm:$0xff] }
 0x17d   : > { %2567 = vmatpush3.bf16.msra.mxu1 %v3130_v24  ;;  %923 = vmatprep.mubr.bf16.mxu0 %v653_v25  ;;  %v569_v24 = vld [vmem:[%s3707_s13 + $0x68] sm:$0xff]  ;;  %v3164_v25 = vld [vmem:[%s4178_s3 + $0xb8] sm:$0xff]  }
 0x17e   : > { %2822 = vmatprep.mubr.bf16.mxu1 %v660_v26  ;;  %2568 = vmatprep.subr.bf16.mxu1 %v3132_v27  ;;  %v676_v26 = vld [vmem:[%s3580_s25 + $0xf0] sm:$0xff]  ;;  %v568_v27 = vld [vmem:[%s3707_s13 + $0x60] sm:$0xff] }
 0x17f   : > { %2675 = vmatpush3.bf16.msra.mxu0 %v3137_v31  ;;  %v571_v31 = vld [vmem:[%s3707_s13 + $0x78] sm:$0xff] }
 0x180   : > { %2676 = vmatprep.subr.bf16.mxu0 %v3141_v38  ;;  %v1545_v38 = vld [vmem:[%s3768_s9 + $0x20] sm:$0xff] }
 0x181   : > { %2569 = vmatpush3.bf16.msra.mxu1 %v3133_v28  ;;  %v680_v28 = vld [vmem:[%s3580_s25 + $0x110] sm:$0xff] }
 0x182   : > { %2570 = vmatprep.subr.bf16.mxu1 %v3134_v30  ;;  %v679_v30 = vld [vmem:[%s3580_s25 + $0x108] sm:$0xff] }
 0x183   : > { %2677 = vmatpush3.bf16.msra.mxu0 %v3143_v39  ;;  %v3785_v39 = vld [vmem:[%s4178_s3 + $0x210] sm:$0xff]  }
 0x184   : > { %924 = vmatmul.mubr.bf16.gmra.mrb[8].mxu0 %v652_v32  ;;  %2823 = vmatmul.mubr.bf16.gmra.mrb[8].mxu1 %v663_v33  ;;  %v575_v32 = vld [vmem:[%s3707_s13 + $0x98] sm:$0xff]  ;;  %v1542_v33 = vld [vmem:[%s3768_s9 + $0x8] sm:$0xff] }
 0x185   : > { %931 = vmatprep.mubr.bf16.mxu0 %v656_v34  ;;  %2826 = vmatprep.mubr.bf16.mxu1 %v666_v35  ;;  %v574_v34 = vld [vmem:[%s3707_s13 + $0x90] sm:$0xff]  ;;  %v1541_v35 = vld [vmem:[%s3768_s9] sm:$0xff] }
 0x186   : > { %2571 = vmatpush3.bf16.msra.mxu1 %v3136_v36  ;;  %2678 = vmatprep.subr.bf16.mxu0 %v3147_v48  ;;  %v578_v36 = vld [vmem:[%s3707_s13 + $0xb0] sm:$0xff]  ;;  %v584_v48 = vld [vmem:[%s3707_s13 + $0xe0] sm:$0xff] }
 0x187   : > { %2572 = vmatprep.subr.bf16.mxu1 %v3138_v37  ;;  %2679 = vmatpush3.bf16.msra.mxu0 %v3148_v49  ;;  %v3777_v37 = vld [vmem:[%s4178_s3 + $0x208] sm:$0xff]   ;;  %v1551_v49 = vld [vmem:[%s3768_s9 + $0x50] sm:$0xff] }
 0x188   : > { %2680 = vmatprep.subr.bf16.mxu0 %v3150_v53  ;;  %v1550_v53 = vld [vmem:[%s3768_s9 + $0x48] sm:$0xff] }
 0x18a   : > { %2573 = vmatpush3.bf16.msra.mxu1 %v3139_v40  ;;  %v577_v40 = vld [vmem:[%s3707_s13 + $0xa8] sm:$0xff] }
 0x18b   : > { %2574 = vmatprep.subr.bf16.mxu1 %v3140_v41  ;;  %2681 = vmatpush3.bf16.msra.mxu0 %v3151_v55  ;;  %v1544_v41 = vld [vmem:[%s3768_s9 + $0x18] sm:$0xff]  ;;  %v1554_v55 = vld [vmem:[%s3768_s9 + $0x68] sm:$0xff] }
 0x18c   : > { %932 = vmatmul.mubr.bf16.gmra.mrb[12].mxu0 %v655_v42  ;;  %2827 = vmatmul.mubr.bf16.gmra.mrb[12].mxu1 %v669_v43  ;;  %v581_v42 = vld [vmem:[%s3707_s13 + $0xc8] sm:$0xff]  ;;  %v1548_v43 = vld [vmem:[%s3768_s9 + $0x38] sm:$0xff] }
 0x18d   : > { %939 = vmatprep.mubr.bf16.mxu0 %v659_v44  ;;  %2830 = vmatprep.mubr.bf16.mxu1 %v672_v45  ;;  %v3796_v44 = vld [vmem:[%s4178_s3 + $0x218] sm:$0xff]   ;;  %v3803_v45 = vld [vmem:[%s4178_s3 + $0x220] sm:$0xff]  }
 0x18e   : > { %2575 = vmatpush3.bf16.msra.mxu1 %v3142_v46  ;;  %2682 = vmatprep.subr.bf16.mxu0 %v3153_v58  ;;  %v580_v46 = vld [vmem:[%s3707_s13 + $0xc0] sm:$0xff] }
 0x18f   : > { %2576 = vmatprep.subr.bf16.mxu1 %v3144_v47  ;;  %2683 = vmatpush3.bf16.msra.mxu0 %v3154_v60  ;;  %v1547_v47 = vld [vmem:[%s3768_s9 + $0x30] sm:$0xff]  ;;  %v1553_v58 = vld [vmem:[%s3768_s9 + $0x60] sm:$0xff] }
 0x190   : > { %2684 = vmatprep.subr.bf16.mxu0 %v3156_v0  ;;  %v1557_v60 = vld [vmem:[%s3768_s9 + $0x80] sm:$0xff]  ;;  %v1560_v0 = vld [vmem:[%s3768_s9 + $0x98] sm:$0xff] }
 0x192   : > { %2577 = vmatpush3.bf16.msra.mxu1 %v3145_v50  ;;  %v3814_v50 = vld [vmem:[%s4178_s3 + $0x228] sm:$0xff]  }
 0x193   : > { %2838 = vmatprep.subr.bf16.mxu1 %v3146_v52  ;;  %2685 = vmatpush3.bf16.msra.mxu0 %v3157_v1  ;;  %v561_v1 = vld [vmem:[%s3707_s13 + $0x28] sm:$0xff] }
 0x194   : > { %940 = vmatmul.mubr.bf16.gmra.mrb[16].mxu0 %v658_v51  ;;  %2831 = vmatmul.mubr.bf16.gmra.mrb[16].mxu1 %v675_v54  ;;  %v3821_v51 = vld [vmem:[%s4178_s3 + $0x230] sm:$0xff]   ;;  %v587_v54 = vld [vmem:[%s3707_s13 + $0xf8] sm:$0xff] }
 0x195   : > { %947 = vmatprep.mubr.bf16.mxu0 %v662_v56  ;;  %2834 = vmatprep.mubr.bf16.mxu1 %v678_v57  ;;  %v3832_v56 = vld [vmem:[%s4178_s3 + $0x238] sm:$0xff]   ;;  %v586_v57 = vld [vmem:[%s3707_s13 + $0xf0] sm:$0xff] }
 0x196   : > { %2878 = vmatprep.subr.bf16.mxu0 %v3720_v3 }
 0x19c   : > { %948 = vmatmul.mubr.bf16.gmra.mrb[20].mxu0 %v661_v59  ;;  %2835 = vmatmul.mubr.bf16.gmra.mrb[20].mxu1 %v681_v61  ;;  %v590_v59 = vld [vmem:[%s3707_s13 + $0x110] sm:$0xff]  ;;  %v589_v61 = vld [vmem:[%s3707_s13 + $0x108] sm:$0xff] }
 0x19d   : > { %955 = vmatprep.mubr.bf16.mxu0 %v665_v62  ;;  %1309 = vmatprep.mubr.bf16.mxu1 %v557_v63  ;;  %v1556_v62 = vld [vmem:[%s3768_s9 + $0x78] sm:$0xff]  ;;  %v558_v63 = vld [vmem:[%s3707_s13 + $0x10] sm:$0xff] }
 0x1a4   : > { %956 = vmatmul.mubr.bf16.gmra.mrb[24].mxu0 %v664_v2  ;;  %1310 = vmatmul.mubr.bf16.vlgmr.msra.gmra.mrb[24].mxu1 %v556_v4  ;;  %v1559_v2 = vld [vmem:[%s3768_s9 + $0x90] sm:$0xff]  ;;  %v564_v4 = vld [vmem:[%s3707_s13 + $0x40] sm:$0xff] }
 0x1a5   : > { %2839 = vmatpush3.bf16.msra.mxu1 %v3146_v52  ;;  %963 = vmatprep.mubr.bf16.mxu0 %v668_v5  ;;  %v583_v52 = vld [vmem:[%s3707_s13 + $0xd8] sm:$0xff]  ;;  %v1563_v5 = vld [vmem:[%s3768_s9 + $0xb0] sm:$0xff] }
 0x1a6   : > { %1317 = vmatprep.mubr.bf16.mxu1 %v560_v7  ;;  %2840 = vmatprep.subr.bf16.mxu1 %v3149_v6  ;;  %v1562_v7 = vld [vmem:[%s3768_s9 + $0xa8] sm:$0xff] }
 0x1a9   : > { %2841 = vmatpush3.bf16.msra.mxu1 %v3149_v6  ;;  %v567_v6 = vld [vmem:[%s3707_s13 + $0x58] sm:$0xff] }
 0x1aa   : > { %2842 = vmatprep.subr.bf16.mxu1 %v3152_v8 }
 0x1ac   : > { %964 = vmatmul.mubr.bf16.gmra.mrb[28].mxu0 %v667_v9  ;;  %1318 = vmatmul.mubr.bf16.gmra.mrb[28].mxu1 %v559_v10  ;;  %v1566_v9 = vld [vmem:[%s3768_s9 + $0xc8] sm:$0xff]  ;;  %v1565_v10 = vld [vmem:[%s3768_s9 + $0xc0] sm:$0xff] }
 0x1ad   : > { %971 = vmatprep.mubr.bf16.mxu0 %v671_v11  ;;  %1325 = vmatprep.mubr.bf16.mxu1 %v563_v12  ;;  %v576_v11 = vld [vmem:[%s3707_s13 + $0xa0] sm:$0xff] }
 0x1ae   : > { %2843 = vmatpush3.bf16.msra.mxu1 %v3152_v8  ;;  %v570_v8 = vld [vmem:[%s3707_s13 + $0x70] sm:$0xff]  ;;  %v1569_v12 = vld [vmem:[%s3768_s9 + $0xe0] sm:$0xff] }
 0x1af   : > { %2844 = vmatprep.subr.bf16.mxu1 %v3155_v13 }
 0x1b2   : > { %2845 = vmatpush3.bf16.msra.mxu1 %v3155_v13  ;;  %v579_v13 = vld [vmem:[%s3707_s13 + $0xb8] sm:$0xff] }
 0x1b3   : > { %2846 = vmatprep.subr.bf16.mxu1 %v3158_v14 }
 0x1b4   : > { %972 = vmatmul.mubr.bf16.gmra.mrb[32].mxu0 %v670_v15  ;;  %1326 = vmatmul.mubr.bf16.gmra.mrb[32].mxu1 %v562_v16  ;;  %v582_v15 = vld [vmem:[%s3707_s13 + $0xd0] sm:$0xff]  ;;  %v1572_v16 = vld [vmem:[%s3768_s9 + $0xf8] sm:$0xff] }
 0x1b5   : > { %979 = vmatprep.mubr.bf16.mxu0 %v674_v17  ;;  %1333 = vmatprep.mubr.bf16.mxu1 %v566_v18  ;;  %v585_v17 = vld [vmem:[%s3707_s13 + $0xe8] sm:$0xff]  ;;  %v1571_v18 = vld [vmem:[%s3768_s9 + $0xf0] sm:$0xff] }
 0x1b6   : > { %2847 = vmatpush3.bf16.msra.mxu1 %v3158_v14  ;;  %v1568_v14 = vld [vmem:[%s3768_s9 + $0xd8] sm:$0xff] }
 0x1b7   : > { %2848 = vmatprep.subr.bf16.mxu1 %v3160_v19 }
 0x1ba   : > { %2849 = vmatpush3.bf16.msra.mxu1 %v3160_v19  ;;  %v588_v19 = vld [vmem:[%s3707_s13 + $0x100] sm:$0xff] }
 0x1bb   : > { %2850 = vmatprep.subr.bf16.mxu1 %v3162_v20 }
 0x1bc   : > { %980 = vmatmul.mubr.bf16.gmra.mrb[36].mxu0 %v673_v21  ;;  %1334 = vmatmul.mubr.bf16.gmra.mrb[36].mxu1 %v565_v22  ;;  %v591_v21 = vld [vmem:[%s3707_s13 + $0x118] sm:$0xff]  ;;  %v1574_v22 = vld [vmem:[%s3768_s9 + $0x108] sm:$0xff] }
 0x1bd   : > { %987 = vmatprep.mubr.bf16.mxu0 %v677_v23  ;;  %1341 = vmatprep.mubr.bf16.mxu1 %v569_v24  ;;  %v1543_v23 = vld [vmem:[%s3768_s9 + $0x10] sm:$0xff]  ;;  %v1561_v24 = vld [vmem:[%s3768_s9 + $0xa0] sm:$0xff] }
 0x1be   : > { %2851 = vmatpush3.bf16.msra.mxu1 %v3162_v20  ;;  %v1575_v20 = vld [vmem:[%s3768_s9 + $0x110] sm:$0xff] }
 0x1bf   : > { %2852 = vmatprep.subr.bf16.mxu1 %v3164_v25 }
 0x1c2   : > { %2853 = vmatpush3.bf16.msra.mxu1 %v3164_v25  ;;  %v1546_v25 = vld [vmem:[%s3768_s9 + $0x28] sm:$0xff] }
 0x1c3   : > { %2918 = vmatprep.subr.bf16.mxu1 %v3720_v3 }
 0x1c4   : > { %988 = vmatmul.mubr.bf16.gmra.mrb[40].mxu0 %v676_v26  ;;  %1342 = vmatmul.mubr.bf16.gmra.mrb[40].mxu1 %v568_v27  ;;  %v1564_v26 = vld [vmem:[%s3768_s9 + $0xb8] sm:$0xff]  ;;  %v1549_v27 = vld [vmem:[%s3768_s9 + $0x40] sm:$0xff] }
 0x1c5   : > { %995 = vmatprep.mubr.bf16.mxu0 %v680_v28  ;;  %1349 = vmatprep.mubr.bf16.mxu1 %v572_v29  ;;  %v1567_v28 = vld [vmem:[%s3768_s9 + $0xd0] sm:$0xff]  ;;  %v1552_v29 = vld [vmem:[%s3768_s9 + $0x58] sm:$0xff] }
 0x1cc   : > { %996 = vmatmul.mubr.bf16.gmra.mrb[44].mxu0 %v679_v30  ;;  %1350 = vmatmul.mubr.bf16.gmra.mrb[44].mxu1 %v571_v31  ;;  %v1570_v30 = vld [vmem:[%s3768_s9 + $0xe8] sm:$0xff]  ;;  %v1555_v31 = vld [vmem:[%s3768_s9 + $0x70] sm:$0xff] }
 0x1cd   : > { %1357 = vmatprep.mubr.bf16.mxu1 %v575_v32  ;;  %1802 = vmatprep.mubr.bf16.mxu0 %v1542_v33  ;;  %v1573_v32 = vld [vmem:[%s3768_s9 + $0x100] sm:$0xff]  ;;  %v1558_v33 = vld [vmem:[%s3768_s9 + $0x88] sm:$0xff] }
 0x1d4   : > { %1358 = vmatmul.mubr.bf16.gmra.mrb[48].mxu1 %v574_v34  ;;  %1803 = vmatmul.mubr.bf16.vlgmr.msra.gmra.mrb[48].mxu0 %v1541_v35  ;;  %v1576_v34 = vld [vmem:[%s3768_s9 + $0x118] sm:$0xff] }
 0x1d5   : > { %2879 = vmatpush3.bf16.msra.mxu0 %v3720_v3  ;;  %1365 = vmatprep.mubr.bf16.mxu1 %v578_v36 }
 0x1d6   : > { %1810 = vmatprep.mubr.bf16.mxu0 %v1545_v38  ;;  %2880 = vmatprep.subr.bf16.mxu0 %v3777_v37 }
 0x1d9   : > { %2881 = vmatpush3.bf16.msra.mxu0 %v3777_v37 }
 0x1da   : > { %2882 = vmatprep.subr.bf16.mxu0 %v3785_v39 }
 0x1dc   : > { %1366 = vmatmul.mubr.bf16.gmra.mrb[52].mxu1 %v577_v40  ;;  %1811 = vmatmul.mubr.bf16.gmra.mrb[52].mxu0 %v1544_v41 }
 0x1dd   : > { %1373 = vmatprep.mubr.bf16.mxu1 %v581_v42  ;;  %1818 = vmatprep.mubr.bf16.mxu0 %v1548_v43 }
 0x1de   : > { %2883 = vmatpush3.bf16.msra.mxu0 %v3785_v39 }
 0x1df   : > { %2884 = vmatprep.subr.bf16.mxu0 %v3796_v44 }
 0x1e2   : > { %2885 = vmatpush3.bf16.msra.mxu0 %v3796_v44 }
 0x1e3   : > { %2886 = vmatprep.subr.bf16.mxu0 %v3803_v45 }
 0x1e4   : > { %1374 = vmatmul.mubr.bf16.gmra.mrb[56].mxu1 %v580_v46  ;;  %1819 = vmatmul.mubr.bf16.gmra.mrb[56].mxu0 %v1547_v47 }
 0x1e5   : > { %1381 = vmatprep.mubr.bf16.mxu1 %v584_v48  ;;  %1826 = vmatprep.mubr.bf16.mxu0 %v1551_v49 }
 0x1e6   : > { %2887 = vmatpush3.bf16.msra.mxu0 %v3803_v45 }
 0x1e7   : > { %2888 = vmatprep.subr.bf16.mxu0 %v3814_v50 }
 0x1ea   : > { %2889 = vmatpush3.bf16.msra.mxu0 %v3814_v50 }
 0x1eb   : > { %2890 = vmatprep.subr.bf16.mxu0 %v3821_v51 }
 0x1ec   : > { %1382 = vmatmul.mubr.bf16.gmra.mrb[60].mxu1 %v583_v52  ;;  %1827 = vmatmul.mubr.bf16.gmra.mrb[60].mxu0 %v1550_v53 }
 0x1ed   : > { %1389 = vmatprep.mubr.bf16.mxu1 %v587_v54  ;;  %1834 = vmatprep.mubr.bf16.mxu0 %v1554_v55 }
 0x1ee   : > { %2891 = vmatpush3.bf16.msra.mxu0 %v3821_v51 }
 0x1ef   : > { %2892 = vmatprep.subr.bf16.mxu0 %v3832_v56 }
 0x1f2   : > { %2893 = vmatpush3.bf16.msra.mxu0 %v3832_v56 }
 0x1f4   : > { %1390 = vmatmul.mubr.bf16.gmra.mrb[64].mxu1 %v586_v57  ;;  %1835 = vmatmul.mubr.bf16.gmra.mrb[64].mxu0 %v1553_v58 }
 0x1f5   : > { %1397 = vmatprep.mubr.bf16.mxu1 %v590_v59  ;;  %1842 = vmatprep.mubr.bf16.mxu0 %v1557_v60 }
 0x1fc   : > { %1398 = vmatmul.mubr.bf16.gmra.mrb[68].mxu1 %v589_v61  ;;  %1843 = vmatmul.mubr.bf16.gmra.mrb[68].mxu0 %v1556_v62 }
 0x1fd   : > { %2854 = vmatprep.mubr.bf16.mxu1 %v558_v63  ;;  %1850 = vmatprep.mubr.bf16.mxu0 %v1560_v0 }
 0x204   : > { %2855 = vmatmul.mubr.bf16.vlgmr.msra.gmra.mrb[0].mxu1 %v561_v1  ;;  %1851 = vmatmul.mubr.bf16.gmra.mrb[72].mxu0 %v1559_v2 }
 0x205   : > { %2926 = vmatpush3.bf16.msra.mxu1 %v3720_v3  ;;  %2858 = vmatprep.mubr.bf16.mxu1 %v564_v4  ;;  %v573_v3 = vld [vmem:[%s3707_s13 + $0x88] sm:$0xff] }
 0x206   : > { %2919 = vmatprep.subr.bf16.mxu1 %v3777_v37  ;;  %1858 = vmatprep.mubr.bf16.mxu0 %v1563_v5 }
 0x209   : > { %2927 = vmatpush3.bf16.msra.mxu1 %v3777_v37 }
 0x20a   : > { %2920 = vmatprep.subr.bf16.mxu1 %v3785_v39 }
 0x20c   : > { %2859 = vmatmul.mubr.bf16.gmra.mrb[4].mxu1 %v567_v6  ;;  %1859 = vmatmul.mubr.bf16.gmra.mrb[76].mxu0 %v1562_v7 }
 0x20d   : > { %2928 = vmatpush3.bf16.msra.mxu1 %v3785_v39  ;;  %2862 = vmatprep.mubr.bf16.mxu1 %v570_v8 }
 0x20e   : > { %1866 = vmatprep.mubr.bf16.mxu0 %v1566_v9  ;;  %2921 = vmatprep.subr.bf16.mxu1 %v3796_v44 }
 0x211   : > { %2929 = vmatpush3.bf16.msra.mxu1 %v3796_v44 }
 0x212   : > { %2922 = vmatprep.subr.bf16.mxu1 %v3803_v45 }
 0x214   : > { %2863 = vmatmul.mubr.bf16.gmra.mrb[8].mxu1 %v573_v3  ;;  %1867 = vmatmul.mubr.bf16.gmra.mrb[80].mxu0 %v1565_v10 }
 0x215   : > { %2866 = vmatprep.mubr.bf16.mxu1 %v576_v11  ;;  %1874 = vmatprep.mubr.bf16.mxu0 %v1569_v12 }
 0x216   : > { %2930 = vmatpush3.bf16.msra.mxu1 %v3803_v45 }
 0x217   : > { %2923 = vmatprep.subr.bf16.mxu1 %v3814_v50 }
 0x21a   : > { %2931 = vmatpush3.bf16.msra.mxu1 %v3814_v50 }
 0x21b   : > { %2924 = vmatprep.subr.bf16.mxu1 %v3821_v51 }
 0x21c   : > { %2867 = vmatmul.mubr.bf16.gmra.mrb[12].mxu1 %v579_v13  ;;  %1875 = vmatmul.mubr.bf16.gmra.mrb[84].mxu0 %v1568_v14 }
 0x21d   : > { %2870 = vmatprep.mubr.bf16.mxu1 %v582_v15  ;;  %1882 = vmatprep.mubr.bf16.mxu0 %v1572_v16 }
 0x21e   : > { %2932 = vmatpush3.bf16.msra.mxu1 %v3821_v51 }
 0x21f   : > { %2925 = vmatprep.subr.bf16.mxu1 %v3832_v56 }
 0x222   : > { %2933 = vmatpush3.bf16.msra.mxu1 %v3832_v56 }
 0x224   : > { %2871 = vmatmul.mubr.bf16.gmra.mrb[16].mxu1 %v585_v17  ;;  %1883 = vmatmul.mubr.bf16.gmra.mrb[88].mxu0 %v1571_v18 }
 0x225   : > { %2874 = vmatprep.mubr.bf16.mxu1 %v588_v19  ;;  %1890 = vmatprep.mubr.bf16.mxu0 %v1575_v20 }
 0x22c   : > { %2875 = vmatmul.mubr.bf16.gmra.mrb[20].mxu1 %v591_v21  ;;  %1891 = vmatmul.mubr.bf16.gmra.mrb[92].mxu0 %v1574_v22 }
 0x22d   : > { %2894 = vmatprep.mubr.bf16.mxu0 %v1543_v23  ;;  %2906 = vmatprep.mubr.bf16.mxu1 %v1561_v24 }
 0x234   : > { %2895 = vmatmul.mubr.bf16.vlgmr.msra.gmra.mrb[96].mxu0 %v1546_v25  ;;  %2907 = vmatmul.mubr.bf16.vlgmr.msra.gmra.mrb[12].mxu1 %v1564_v26 }
 0x235   : > { %2898 = vmatprep.mubr.bf16.mxu0 %v1549_v27  ;;  %2910 = vmatprep.mubr.bf16.mxu1 %v1567_v28 }
 0x23c   : > { %2899 = vmatmul.mubr.bf16.gmra.mrb[100].mxu0 %v1552_v29  ;;  %2911 = vmatmul.mubr.bf16.gmra.mrb[16].mxu1 %v1570_v30 }
 0x23d   : > { %2902 = vmatprep.mubr.bf16.mxu0 %v1555_v31  ;;  %2914 = vmatprep.mubr.bf16.mxu1 %v1573_v32 }
 0x244   : > { %2903 = vmatmul.mubr.bf16.gmra.mrb[104].mxu0 %v1558_v33  ;;  %2915 = vmatmul.mubr.bf16.gmra.mrb[20].mxu1 %v1576_v34 }
 0x247   : > { %v2470_v35 = vpop.f32.mrb[0].mxu0 }
 0x248   : > { %v2471_v36 = vpop.f32.mrb[1].mxu0 }
 0x249   : > { %v2472_v37 = vadd.f32 %v2471_v36, %v2470_v35  ;;  %v2473_v38 = vpop.f32.mrb[2].mxu0 }
 0x24a   : > { %v2474_v39 = vpop.f32.mrb[3].mxu0 }
 0x24b   : > { %v2475_v40 = vadd.f32 %v2474_v39, %v2473_v38 }
 0x24f   : > { %v2476_v41 = vpop.f32.mrb[4].mxu0 }
 0x250   : > { %v2477_v42 = vpop.f32.mrb[5].mxu0 }
 0x251   : > { %v2478_v43 = vadd.f32 %v2477_v42, %v2476_v41  ;;  %v2479_v44 = vpop.f32.mrb[6].mxu0 }
 0x252   : > { %v2480_v45 = vpop.f32.mrb[7].mxu0 }
 0x253   : > { %v2481_v46 = vadd.f32 %v2480_v45, %v2479_v44 }
 0x257   : > { %v2482_v47 = vpop.f32.mrb[8].mxu0 }
 0x258   : > { %v2483_v48 = vpop.f32.mrb[9].mxu0 }
 0x259   : > { %v2484_v49 = vadd.f32 %v2483_v48, %v2482_v47  ;;  %v2485_v50 = vpop.f32.mrb[10].mxu0 }
 0x25a   : > { %v2486_v51 = vpop.f32.mrb[11].mxu0 }
 0x25b   : > { %v2487_v52 = vadd.f32 %v2486_v51, %v2485_v50 }
 0x25f   : > { %v2488_v53 = vpop.f32.mrb[12].mxu0 }
 0x260   : > { %v2489_v54 = vpop.f32.mrb[13].mxu0 }
 0x261   : > { %v3894_v55 = vadd.f32 %v2489_v54, %v2488_v53  ;;  %v2491_v56 = vpop.f32.mrb[14].mxu0 }
 0x262   : > { %v2492_v57 = vpop.f32.mrb[15].mxu0 }
 0x263   : > { %v3896_v58 = vadd.f32 %v2492_v57, %v2491_v56 }
 0x267   : > { %v2494_v59 = vpop.f32.mrb[16].mxu0 }
 0x268   : > { %v2495_v60 = vpop.f32.mrb[17].mxu0 }
 0x269   : > { %v3898_v61 = vadd.f32 %v2495_v60, %v2494_v59  ;;  %v2497_v62 = vpop.f32.mrb[18].mxu0 }
 0x26a   : > { %v2498_v63 = vpop.f32.mrb[19].mxu0 }
 0x26b   : > { %v3900_v0 = vadd.f32 %v2498_v63, %v2497_v62 }
 0x26f   : > { %v2500_v1 = vpop.f32.mrb[20].mxu0 }
 0x270   : > { %v2501_v2 = vpop.f32.mrb[21].mxu0 }
 0x271   : > { %v3902_v4 = vadd.f32 %v2501_v2, %v2500_v1  ;;  %v2503_v5 = vpop.f32.mrb[22].mxu0 }
 0x272   : > { %v2504_v6 = vpop.f32.mrb[23].mxu0 }
 0x273   : > { %v3904_v7 = vadd.f32 %v2504_v6, %v2503_v5 }
 0x277   : > { %v2506_v8 = vpop.f32.mrb[24].mxu0  ;;  %v2578_v9 = vpop.f32.mrb[24].mxu1 }
 0x278   : > { %v2507_v3 = vpop.f32.mrb[25].mxu0  ;;  %v2579_v10 = vpop.f32.mrb[25].mxu1 }
 0x279   : > { %v3906_v11 = vadd.f32 %v2507_v3, %v2506_v8  ;;  %v2580_v12 = vadd.f32 %v2579_v10, %v2578_v9  ;;  %v2509_v13 = vpop.f32.mrb[26].mxu0  ;;  %v2581_v14 = vpop.f32.mrb[26].mxu1 }
 0x27a   : > { %v2510_v15 = vpop.f32.mrb[27].mxu0  ;;  %v2582_v16 = vpop.f32.mrb[27].mxu1 }
 0x27b   : > { %v3908_v17 = vadd.f32 %v2510_v15, %v2509_v13  ;;  %v2583_v18 = vadd.f32 %v2582_v16, %v2581_v14  ;;  %v3910_v19 = vadd.f32 %v2580_v12, %v2472_v37 }
 0x27d   : > { %v3912_v20 = vadd.f32 %v2583_v18, %v2475_v40 }
 0x27f   : > { %v2512_v21 = vpop.f32.mrb[28].mxu0  ;;  %v2584_v22 = vpop.f32.mrb[28].mxu1 }
 0x280   : > { %v2513_v23 = vpop.f32.mrb[29].mxu0  ;;  %v2585_v24 = vpop.f32.mrb[29].mxu1 }
 0x281   : > { %v3914_v25 = vadd.f32 %v2513_v23, %v2512_v21  ;;  %v2586_v26 = vadd.f32 %v2585_v24, %v2584_v22  ;;  %v2515_v27 = vpop.f32.mrb[30].mxu0  ;;  %v2587_v28 = vpop.f32.mrb[30].mxu1 }
 0x282   : > { %v2516_v29 = vpop.f32.mrb[31].mxu0  ;;  %v2588_v30 = vpop.f32.mrb[31].mxu1 }
 0x283   : > { %v3916_v31 = vadd.f32 %v2516_v29, %v2515_v27  ;;  %v2589_v32 = vadd.f32 %v2588_v30, %v2587_v28  ;;  %v3918_v33 = vadd.f32 %v2586_v26, %v2478_v43 }
 0x285   : > { %v3920_v34 = vadd.f32 %v2589_v32, %v2481_v46 }
 0x287   : > { %v2518_v35 = vpop.f32.mrb[32].mxu0  ;;  %v2590_v36 = vpop.f32.mrb[32].mxu1 }
 0x288   : > { %v2519_v37 = vpop.f32.mrb[33].mxu0  ;;  %v2591_v38 = vpop.f32.mrb[33].mxu1 }
 0x289   : > { %v3922_v39 = vadd.f32 %v2519_v37, %v2518_v35  ;;  %v2592_v40 = vadd.f32 %v2591_v38, %v2590_v36  ;;  %v2521_v41 = vpop.f32.mrb[34].mxu0  ;;  %v2593_v42 = vpop.f32.mrb[34].mxu1 }
 0x28a   : > { %v2522_v44 = vpop.f32.mrb[35].mxu0  ;;  %v2594_v45 = vpop.f32.mrb[35].mxu1 }
 0x28b   : > { %v3924_v47 = vadd.f32 %v2522_v44, %v2521_v41  ;;  %v2595_v48 = vadd.f32 %v2594_v45, %v2593_v42  ;;  %v3926_v50 = vadd.f32 %v2592_v40, %v2484_v49 }
 0x28d   : > { %v3928_v43 = vadd.f32 %v2595_v48, %v2487_v52 }
 0x28f   : > { %v2524_v46 = vpop.f32.mrb[36].mxu0  ;;  %v2596_v51 = vpop.f32.mrb[36].mxu1 }
 0x290   : > { %v2525_v53 = vpop.f32.mrb[37].mxu0  ;;  %v2597_v54 = vpop.f32.mrb[37].mxu1 }
 0x291   : > { %v3930_v56 = vadd.f32 %v2525_v53, %v2524_v46  ;;  %v2598_v57 = vadd.f32 %v2597_v54, %v2596_v51  ;;  %v2527_v59 = vpop.f32.mrb[38].mxu0  ;;  %v2599_v60 = vpop.f32.mrb[38].mxu1 }
 0x292   : > { %v2528_v62 = vpop.f32.mrb[39].mxu0  ;;  %v2600_v63 = vpop.f32.mrb[39].mxu1 }
 0x293   : > { %v3932_v1 = vadd.f32 %v2528_v62, %v2527_v59  ;;  %v2601_v2 = vadd.f32 %v2600_v63, %v2599_v60  ;;  %v3935_v5 = vadd.f32 %v2598_v57, %v3894_v55 }
 0x295   : > { %v3938_v49 = vadd.f32 %v2601_v2, %v3896_v58 }
 0x297   : > { %v2530_v52 = vpop.f32.mrb[40].mxu0  ;;  %v2602_v6 = vpop.f32.mrb[40].mxu1 }
 0x298   : > { %v2531_v8 = vpop.f32.mrb[41].mxu0  ;;  %v2603_v9 = vpop.f32.mrb[41].mxu1 }
 0x299   : > { %v3940_v3 = vadd.f32 %v2531_v8, %v2530_v52  ;;  %v2604_v10 = vadd.f32 %v2603_v9, %v2602_v6  ;;  %v2533_v12 = vpop.f32.mrb[42].mxu0  ;;  %v2605_v13 = vpop.f32.mrb[42].mxu1 }
 0x29a   : > { %v2534_v14 = vpop.f32.mrb[43].mxu0  ;;  %v2606_v15 = vpop.f32.mrb[43].mxu1 }
 0x29b   : > { %v3942_v16 = vadd.f32 %v2534_v14, %v2533_v12  ;;  %v2607_v18 = vadd.f32 %v2606_v15, %v2605_v13  ;;  %v3945_v55 = vadd.f32 %v2604_v10, %v3898_v61 }
 0x29d   : > { %v3948_v58 = vadd.f32 %v2607_v18, %v3900_v0 }
 0x29f   : > { %v2536_v21 = vpop.f32.mrb[44].mxu0  ;;  %v2608_v22 = vpop.f32.mrb[44].mxu1 }
 0x2a0   : > { %v2537_v23 = vpop.f32.mrb[45].mxu0  ;;  %v2609_v24 = vpop.f32.mrb[45].mxu1 }
 0x2a1   : > { %v3950_v26 = vadd.f32 %v2537_v23, %v2536_v21  ;;  %v2610_v27 = vadd.f32 %v2609_v24, %v2608_v22  ;;  %v2539_v28 = vpop.f32.mrb[46].mxu0  ;;  %v2611_v29 = vpop.f32.mrb[46].mxu1 }
 0x2a2   : > { %v2540_v30 = vpop.f32.mrb[47].mxu0  ;;  %v2612_v32 = vpop.f32.mrb[47].mxu1 }
 0x2a3   : > { %v3952_v35 = vadd.f32 %v2540_v30, %v2539_v28  ;;  %v2613_v36 = vadd.f32 %v2612_v32, %v2611_v29  ;;  %v3955_v61 = vadd.f32 %v2610_v27, %v3902_v4 }
 0x2a5   : > { %v3958_v0 = vadd.f32 %v2613_v36, %v3904_v7 }
 0x2a7   : > { %v2614_v37 = vpop.f32.mrb[48].mxu1  ;;  %v2686_v38 = vpop.f32.mrb[48].mxu0 }
 0x2a8   : > { %v2615_v40 = vpop.f32.mrb[49].mxu1  ;;  %v2687_v41 = vpop.f32.mrb[49].mxu0 }
 0x2a9   : > { %v2616_v42 = vadd.f32 %v2615_v40, %v2614_v37  ;;  %v3960_v44 = vadd.f32 %v2687_v41, %v2686_v38  ;;  %v2617_v45 = vpop.f32.mrb[50].mxu1  ;;  %v2689_v48 = vpop.f32.mrb[50].mxu0 }
 0x2aa   : > { %v2618_v46 = vpop.f32.mrb[51].mxu1  ;;  %v2690_v51 = vpop.f32.mrb[51].mxu0 }
 0x2ab   : > { %v3963_v53 = vadd.f32 %v2616_v42, %v3906_v11  ;;  %v2619_v54 = vadd.f32 %v2618_v46, %v2617_v45  ;;  %v3965_v4 = vadd.f32 %v2690_v51, %v2689_v48 }
 0x2ad   : > { %v3968_v7 = vadd.f32 %v2619_v54, %v3908_v17 }
 0x2af   : > { %v2620_v57 = vpop.f32.mrb[52].mxu1  ;;  %v2692_v59 = vpop.f32.mrb[52].mxu0 }
 0x2b0   : > { %v2621_v60 = vpop.f32.mrb[53].mxu1  ;;  %v2693_v62 = vpop.f32.mrb[53].mxu0 }
 0x2b1   : > { %v2622_v63 = vadd.f32 %v2621_v60, %v2620_v57  ;;  %v3970_v2 = vadd.f32 %v2693_v62, %v2692_v59  ;;  %v2623_v52 = vpop.f32.mrb[54].mxu1  ;;  %v2695_v6 = vpop.f32.mrb[54].mxu0 }
 0x2b2   : > { %v2624_v8 = vpop.f32.mrb[55].mxu1  ;;  %v2696_v9 = vpop.f32.mrb[55].mxu0 }
 0x2b3   : > { %v3973_v11 = vadd.f32 %v2622_v63, %v3914_v25  ;;  %v2625_v10 = vadd.f32 %v2624_v8, %v2623_v52  ;;  %v3975_v12 = vadd.f32 %v2696_v9, %v2695_v6 }
 0x2b5   : > { %v3978_v17 = vadd.f32 %v2625_v10, %v3916_v31 }
 0x2b7   : > { %v2626_v13 = vpop.f32.mrb[56].mxu1  ;;  %v2698_v14 = vpop.f32.mrb[56].mxu0 }
 0x2b8   : > { %v2627_v15 = vpop.f32.mrb[57].mxu1  ;;  %v2699_v18 = vpop.f32.mrb[57].mxu0 }
 0x2b9   : > { %v2628_v21 = vadd.f32 %v2627_v15, %v2626_v13  ;;  %v3980_v22 = vadd.f32 %v2699_v18, %v2698_v14  ;;  %v2629_v23 = vpop.f32.mrb[58].mxu1  ;;  %v2701_v24 = vpop.f32.mrb[58].mxu0 }
 0x2ba   : > { %v2630_v27 = vpop.f32.mrb[59].mxu1  ;;  %v2702_v28 = vpop.f32.mrb[59].mxu0 }
 0x2bb   : > { %v3983_v25 = vadd.f32 %v2628_v21, %v3922_v39  ;;  %v2631_v29 = vadd.f32 %v2630_v27, %v2629_v23  ;;  %v3985_v30 = vadd.f32 %v2702_v28, %v2701_v24 }
 0x2bd   : > { %v3988_v31 = vadd.f32 %v2631_v29, %v3924_v47 }
 0x2bf   : > { %v2632_v32 = vpop.f32.mrb[60].mxu1  ;;  %v2704_v36 = vpop.f32.mrb[60].mxu0 }
 0x2c0   : > { %v2633_v37 = vpop.f32.mrb[61].mxu1  ;;  %v2705_v38 = vpop.f32.mrb[61].mxu0 }
 0x2c1   : > { %v2634_v40 = vadd.f32 %v2633_v37, %v2632_v32  ;;  %v3990_v41 = vadd.f32 %v2705_v38, %v2704_v36  ;;  %v2635_v42 = vpop.f32.mrb[62].mxu1  ;;  %v2707_v45 = vpop.f32.mrb[62].mxu0 }
 0x2c2   : > { %v2636_v48 = vpop.f32.mrb[63].mxu1  ;;  %v2708_v46 = vpop.f32.mrb[63].mxu0 }
 0x2c3   : > { %v3993_v39 = vadd.f32 %v2634_v40, %v3930_v56  ;;  %v2637_v51 = vadd.f32 %v2636_v48, %v2635_v42  ;;  %v3995_v54 = vadd.f32 %v2708_v46, %v2707_v45 }
 0x2c5   : > { %v3998_v47 = vadd.f32 %v2637_v51, %v3932_v1 }
 0x2c7   : > { %v2638_v57 = vpop.f32.mrb[64].mxu1  ;;  %v2710_v59 = vpop.f32.mrb[64].mxu0 }
 0x2c8   : > { %v2639_v60 = vpop.f32.mrb[65].mxu1  ;;  %v2711_v62 = vpop.f32.mrb[65].mxu0 }
 0x2c9   : > { %v2640_v63 = vadd.f32 %v2639_v60, %v2638_v57  ;;  %v4000_v52 = vadd.f32 %v2711_v62, %v2710_v59  ;;  %v2641_v6 = vpop.f32.mrb[66].mxu1  ;;  %v2713_v8 = vpop.f32.mrb[66].mxu0 }
 0x2ca   : > { %v2642_v9 = vpop.f32.mrb[67].mxu1  ;;  %v2714_v10 = vpop.f32.mrb[67].mxu0 }
 0x2cb   : > { %v4003_v56 = vadd.f32 %v2640_v63, %v3940_v3  ;;  %v2643_v13 = vadd.f32 %v2642_v9, %v2641_v6  ;;  %v4005_v14 = vadd.f32 %v2714_v10, %v2713_v8 }
 0x2cd   : > { %v4008_v1 = vadd.f32 %v2643_v13, %v3942_v16 }
 0x2cf   : > { %v2644_v15 = vpop.f32.mrb[68].mxu1  ;;  %v2716_v18 = vpop.f32.mrb[68].mxu0 }
 0x2d0   : > { %v2645_v21 = vpop.f32.mrb[69].mxu1  ;;  %v2717_v23 = vpop.f32.mrb[69].mxu0 }
 0x2d1   : > { %v2646_v24 = vadd.f32 %v2645_v21, %v2644_v15  ;;  %v2718_v27 = vadd.f32 %v2717_v23, %v2716_v18  ;;  %v2647_v28 = vpop.f32.mrb[70].mxu1  ;;  %v2719_v29 = vpop.f32.mrb[70].mxu0 }
 0x2d2   : > { %v2648_v32 = vpop.f32.mrb[71].mxu1  ;;  %v2720_v36 = vpop.f32.mrb[71].mxu0 }
 0x2d3   : > { %v4011_v37 = vadd.f32 %v2646_v24, %v3950_v26  ;;  %v2649_v3 = vadd.f32 %v2648_v32, %v2647_v28  ;;  %v2721_v38 = vadd.f32 %v2720_v36, %v2719_v29 }
 0x2d5   : > { %v4014_v40 = vadd.f32 %v2649_v3, %v3952_v35 }
 0x2d7   : > { %v2856_v16 = vpop.f32.mrb[0].mxu1  ;;  %v2722_v42 = vpop.f32.mrb[72].mxu0 }
 0x2d8   : > { %v2935_v45 = vadd.f32 %v3918_v33, %v2856_v16  ;;  %v1440_v48 = vpop.f32.mrb[1].mxu1  ;;  %v2723_v46 = vpop.f32.mrb[73].mxu0 }
 0x2d9   : > { %v2939_v51 = vadd.f32 %v3910_v19, %v1440_v48  ;;  %v2724_v57 = vadd.f32 %v2723_v46, %v2722_v42  ;;  %v2857_v59 = vpop.f32.mrb[2].mxu1  ;;  %v2725_v60 = vpop.f32.mrb[74].mxu0 }
 0x2da   : > { %v2943_v62 = vadd.f32 %v3920_v34, %v2857_v59  ;;  %v1443_v26 = vpop.f32.mrb[3].mxu1  ;;  %v2726_v63 = vpop.f32.mrb[75].mxu0  ;;  %v4020_v6 = vadd.f32 %v2935_v45, %v3970_v2 }
 0x2db   : > { %v2947_v35 = vadd.f32 %v3912_v20, %v1443_v26  ;;  %v2727_v8 = vadd.f32 %v2726_v63, %v2725_v60  ;;  %v4024_v9 = vadd.f32 %v2939_v51, %v3960_v44  ;;  %v4027_v33 = vadd.f32 %v3963_v53, %v2724_v57 }
 0x2dc   : > { %v4030_v19 = vadd.f32 %v2943_v62, %v3975_v12 }
 0x2dd   : > { %v4033_v10 = vadd.f32 %v2947_v35, %v3965_v4  ;;  %v4036_v34 = vadd.f32 %v3968_v7, %v2727_v8 }
 0x2df   : > { %v2860_v2 = vpop.f32.mrb[4].mxu1  ;;  %v2728_v13 = vpop.f32.mrb[76].mxu0 }
 0x2e0   : > { %v2951_v20 = vadd.f32 %v3935_v5, %v2860_v2  ;;  %v1456_v15 = vpop.f32.mrb[5].mxu1  ;;  %v2729_v18 = vpop.f32.mrb[77].mxu0 }
 0x2e1   : > { %v2955_v44 = vadd.f32 %v3926_v50, %v1456_v15  ;;  %v2730_v21 = vadd.f32 %v2729_v18, %v2728_v13  ;;  %v2861_v53 = vpop.f32.mrb[6].mxu1  ;;  %v2731_v23 = vpop.f32.mrb[78].mxu0 }
 0x2e2   : > { %v2959_v12 = vadd.f32 %v3938_v49, %v2861_v53  ;;  %v1459_v24 = vpop.f32.mrb[7].mxu1  ;;  %v2732_v28 = vpop.f32.mrb[79].mxu0  ;;  %v4042_v4 = vadd.f32 %v2951_v20, %v3990_v41 }
 0x2e3   : > { %v2963_v7 = vadd.f32 %v3928_v43, %v1459_v24  ;;  %v2733_v29 = vadd.f32 %v2732_v28, %v2731_v23  ;;  %v2983_v32 = vadd.f32 %v3973_v11, %v2730_v21  ;;  %v4047_v5 = vadd.f32 %v2955_v44, %v3980_v22 }
 0x2e4   : > { %v4050_v50 = vadd.f32 %v2959_v12, %v3995_v54 }
 0x2e5   : > { %v2989_v36 = vadd.f32 %v3978_v17, %v2733_v29  ;;  %v4054_v49 = vadd.f32 %v2963_v7, %v3985_v30 }
 0x2e7   : > { %v2864_v3 = vpop.f32.mrb[8].mxu1  ;;  %v2734_v16 = vpop.f32.mrb[80].mxu0 }
 0x2e8   : > { %v2967_v41 = vadd.f32 %v3955_v61, %v2864_v3  ;;  %v1472_v42 = vpop.f32.mrb[9].mxu1  ;;  %v2735_v43 = vpop.f32.mrb[81].mxu0 }
 0x2e9   : > { %v2971_v45 = vadd.f32 %v3945_v55, %v1472_v42  ;;  %v2736_v11 = vadd.f32 %v2735_v43, %v2734_v16  ;;  %v2865_v48 = vpop.f32.mrb[10].mxu1  ;;  %v2737_v22 = vpop.f32.mrb[82].mxu0 }
 0x2ea   : > { %v2975_v46 = vadd.f32 %v3958_v0, %v2865_v48  ;;  %v1475_v54 = vpop.f32.mrb[11].mxu1  ;;  %v2738_v51 = vpop.f32.mrb[83].mxu0  ;;  %v4059_v57 = vadd.f32 %v2967_v41, %v2718_v27 }
 0x2eb   : > { %v2979_v17 = vadd.f32 %v3948_v58, %v1475_v54  ;;  %v2739_v30 = vadd.f32 %v2738_v51, %v2737_v22  ;;  %v4063_v59 = vadd.f32 %v3983_v25, %v2736_v11  ;;  %v4066_v61 = vadd.f32 %v2971_v45, %v4000_v52 }
 0x2ec   : > { %v4068_v60 = vadd.f32 %v2975_v46, %v2721_v38 }
 0x2ed   : > { %v4071_v55 = vadd.f32 %v3988_v31, %v2739_v30  ;;  %v4074_v0 = vadd.f32 %v2979_v17, %v4005_v14 }
 0x2ef   : > { %v2740_v62 = vpop.f32.mrb[84].mxu0 }
 0x2f0   : > { %v2741_v27 = vpop.f32.mrb[85].mxu0 }
 0x2f1   : > { %v2742_v26 = vadd.f32 %v2741_v27, %v2740_v62  ;;  %v2743_v63 = vpop.f32.mrb[86].mxu0 }
 0x2f2   : > { %v2744_v58 = vpop.f32.mrb[87].mxu0 }
 0x2f3   : > { %v2745_v35 = vadd.f32 %v2744_v58, %v2743_v63  ;;  %v2995_v25 = vadd.f32 %v3993_v39, %v2742_v26 }
 0x2f5   : > { %v4078_v8 = vadd.f32 %v3998_v47, %v2745_v35 }
 0x2f7   : > { %v2746_v52 = vpop.f32.mrb[88].mxu0 }
 0x2f8   : > { %v2747_v38 = vpop.f32.mrb[89].mxu0 }
 0x2f9   : > { %v2748_v2 = vadd.f32 %v2747_v38, %v2746_v52  ;;  %v2749_v13 = vpop.f32.mrb[90].mxu0 }
 0x2fa   : > { %v2750_v31 = vpop.f32.mrb[91].mxu0 }
 0x2fb   : > { %v2751_v20 = vadd.f32 %v2750_v31, %v2749_v13  ;;  %v4081_v14 = vadd.f32 %v4003_v56, %v2748_v2  ;;  %v4095_v56 = vld [vmem:[%s4179_s4] ss:$0 sm:$0xff] }
 0x2fd   : > { %v4084_v15 = vadd.f32 %v4008_v1, %v2751_v20 }
 0x2ff   : > { %v2752_v18 = vpop.f32.mrb[92].mxu0 }
 0x300   : > { %v2753_v44 = vpop.f32.mrb[93].mxu0 }
 0x301   : > { %v2754_v21 = vadd.f32 %v2753_v44, %v2752_v18  ;;  %v2755_v53 = vpop.f32.mrb[94].mxu0 }
 0x302   : > { %v2756_v39 = vpop.f32.mrb[95].mxu0 }
 0x303   : > { %v2757_v23 = vadd.f32 %v2756_v39, %v2755_v53  ;;  %v4087_v47 = vadd.f32 %v4011_v37, %v2754_v21 }
 0x305   : > { %v4090_v12 = vadd.f32 %v4014_v40, %v2757_v23 }
 0x307   : > { %v2896_v24 = vpop.f32.mrb[96].mxu0  ;;  %v2908_v1 = vpop.f32.mrb[12].mxu1 }
 0x308   : > { %v2937_v28 = vadd.f32 %v4020_v6, %v2896_v24  ;;  %v2984_v7 = vadd.f32 %v2983_v32, %v2908_v1  ;;  %v1933_v29 = vpop.f32.mrb[97].mxu0  ;;  %v1981_v3 = vpop.f32.mrb[13].mxu1 }
 0x309   : > { %v2941_v16 = vadd.f32 %v4024_v9, %v1933_v29  ;;  %v2987_v37 = vadd.f32 %v4027_v33, %v1981_v3  ;;  %v2897_v41 = vpop.f32.mrb[98].mxu0  ;;  %v2909_v42 = vpop.f32.mrb[14].mxu1 }
 0x30a   : > { %v2061_v40 = vadd.f32 %v2937_v28, %v4095_v56  ;;  %v2073_v43 = vadd.f32 %v2984_v7, %v4095_v56  ;;  %v2945_v45 = vadd.f32 %v4030_v19, %v2897_v41  ;;  %v2990_v11 = vadd.f32 %v2989_v36, %v2909_v42  ;;  %v1936_v48 = vpop.f32.mrb[99].mxu0  ;;  %v1984_v6 = vpop.f32.mrb[15].mxu1 }
 0x30b   : > { %v2059_v32 = vadd.f32 %v2941_v16, %v4095_v56  ;;  %v2071_v9 = vadd.f32 %v2987_v37, %v4095_v56  ;;  %v2949_v33 = vadd.f32 %v4033_v10, %v1936_v48  ;;  %v2993_v22 = vadd.f32 %v4036_v34, %v1984_v6 }
 0x30c   : > { %v2085_v46 = vmax.f32 %v2061_v40, 0.0  ;;  %v2097_v54 = vmax.f32 %v2073_v43, 0.0  ;;  %v2062_v51 = vadd.f32 %v2945_v45, %v4095_v56  ;;  %v2074_v19 = vadd.f32 %v2990_v11, %v4095_v56 }
 0x30d   : > { %v2083_v36 = vmax.f32 %v2059_v32, 0.0  ;;  %v2095_v17 = vmax.f32 %v2071_v9, 0.0  ;;  %v2060_v30 = vadd.f32 %v2949_v33, %v4095_v56  ;;  %v2072_v62 = vadd.f32 %v2993_v22, %v4095_v56 }
 0x30e   : > { %2109 = vst [vmem:[%s3268_s26 + $0x10] sm:$0xff] %v2085_v46  ;;  %2121 = vst [vmem:[%s3268_s26 + $0x70] sm:$0xff] %v2097_v54  ;;  %v2086_v10 = vmax.f32 %v2062_v51, 0.0  ;;  %v2098_v34 = vmax.f32 %v2074_v19, 0.0 }
 0x30f   : > { %2107 = vst [vmem:[%s3268_s26] sm:$0xff] %v2083_v36  ;;  %2119 = vst [vmem:[%s3268_s26 + $0x60] sm:$0xff] %v2095_v17  ;;  %v2084_v27 = vmax.f32 %v2060_v30, 0.0  ;;  %v2096_v26 = vmax.f32 %v2072_v62, 0.0  ;;  %v2900_v63 = vpop.f32.mrb[100].mxu0  ;;  %v2912_v58 = vpop.f32.mrb[16].mxu1 }
 0x310   : > { %2110 = vst [vmem:[%s3268_s26 + $0x18] sm:$0xff] %v2086_v10  ;;  %2122 = vst [vmem:[%s3268_s26 + $0x78] sm:$0xff] %v2098_v34  ;;  %v2953_v35 = vadd.f32 %v4042_v4, %v2900_v63  ;;  %v2996_v52 = vadd.f32 %v2995_v25, %v2912_v58  ;;  %v1949_v38 = vpop.f32.mrb[101].mxu0  ;;  %v1997_v2 = vpop.f32.mrb[17].mxu1 }
 0x311   : > { %2108 = vst [vmem:[%s3268_s26 + $0x8] sm:$0xff] %v2084_v27  ;;  %2120 = vst [vmem:[%s3268_s26 + $0x68] sm:$0xff] %v2096_v26  ;;  %v2957_v13 = vadd.f32 %v4047_v5, %v1949_v38  ;;  %v2999_v31 = vadd.f32 %v4063_v59, %v1997_v2  ;;  %v2901_v20 = vpop.f32.mrb[102].mxu0  ;;  %v2913_v18 = vpop.f32.mrb[18].mxu1 }
 0x312   : > { %v2065_v44 = vadd.f32 %v2953_v35, %v4095_v56  ;;  %v2077_v21 = vadd.f32 %v2996_v52, %v4095_v56  ;;  %v2961_v53 = vadd.f32 %v4050_v50, %v2901_v20  ;;  %v3002_v4 = vadd.f32 %v4078_v8, %v2913_v18  ;;  %v1952_v25 = vpop.f32.mrb[103].mxu0  ;;  %v2000_v39 = vpop.f32.mrb[19].mxu1 }
 0x313   : > { %v2063_v23 = vadd.f32 %v2957_v13, %v4095_v56  ;;  %v2075_v5 = vadd.f32 %v2999_v31, %v4095_v56  ;;  %v2965_v59 = vadd.f32 %v4054_v49, %v1952_v25  ;;  %v3005_v24 = vadd.f32 %v4071_v55, %v2000_v39 }
 0x314   : > { %v2089_v1 = vmax.f32 %v2065_v44, 0.0  ;;  %v2101_v28 = vmax.f32 %v2077_v21, 0.0  ;;  %v2066_v50 = vadd.f32 %v2961_v53, %v4095_v56  ;;  %v2078_v8 = vadd.f32 %v3002_v4, %v4095_v56 }
 0x315   : > { %v2087_v7 = vmax.f32 %v2063_v23, 0.0  ;;  %v2099_v29 = vmax.f32 %v2075_v5, 0.0  ;;  %v2064_v3 = vadd.f32 %v2965_v59, %v4095_v56  ;;  %v2076_v16 = vadd.f32 %v3005_v24, %v4095_v56 }
 0x316   : > { %2113 = vst [vmem:[%s3268_s26 + $0x30] sm:$0xff] %v2089_v1  ;;  %2125 = vst [vmem:[%s3268_s26 + $0x90] sm:$0xff] %v2101_v28  ;;  %v2090_v49 = vmax.f32 %v2066_v50, 0.0  ;;  %v2102_v55 = vmax.f32 %v2078_v8, 0.0 }
 0x317   : > { %2111 = vst [vmem:[%s3268_s26 + $0x20] sm:$0xff] %v2087_v7  ;;  %2123 = vst [vmem:[%s3268_s26 + $0x80] sm:$0xff] %v2099_v29  ;;  %v2088_v37 = vmax.f32 %v2064_v3, 0.0  ;;  %v2100_v41 = vmax.f32 %v2076_v16, 0.0  ;;  %v2904_v42 = vpop.f32.mrb[104].mxu0  ;;  %v2916_v40 = vpop.f32.mrb[20].mxu1 }
 0x318   : > { %2114 = vst [vmem:[%s3268_s26 + $0x38] sm:$0xff] %v2090_v49  ;;  %2126 = vst [vmem:[%s3268_s26 + $0x98] sm:$0xff] %v2102_v55  ;;  %v2969_v43 = vadd.f32 %v4059_v57, %v2904_v42  ;;  %v3008_v45 = vadd.f32 %v4087_v47, %v2916_v40  ;;  %v1965_v11 = vpop.f32.mrb[105].mxu0  ;;  %v2013_v48 = vpop.f32.mrb[21].mxu1 }
 0x319   : > { %2112 = vst [vmem:[%s3268_s26 + $0x28] sm:$0xff] %v2088_v37  ;;  %2124 = vst [vmem:[%s3268_s26 + $0x88] sm:$0xff] %v2100_v41  ;;  %v2973_v6 = vadd.f32 %v4066_v61, %v1965_v11  ;;  %v3011_v32 = vadd.f32 %v4081_v14, %v2013_v48  ;;  %v2905_v9 = vpop.f32.mrb[106].mxu0  ;;  %v2917_v33 = vpop.f32.mrb[22].mxu1 }
 0x31a   : > { %v2069_v22 = vadd.f32 %v2969_v43, %v4095_v56  ;;  %v2081_v46 = vadd.f32 %v3008_v45, %v4095_v56  ;;  %v2977_v54 = vadd.f32 %v4068_v60, %v2905_v9  ;;  %v3014_v57 = vadd.f32 %v4090_v12, %v2917_v33  ;;  %v1968_v47 = vpop.f32.mrb[107].mxu0  ;;  %v2016_v51 = vpop.f32.mrb[23].mxu1 }
 0x31b   : > { %v2067_v19 = vadd.f32 %v2973_v6, %v4095_v56  ;;  %v2079_v61 = vadd.f32 %v3011_v32, %v4095_v56  ;;  %v2981_v14 = vadd.f32 %v4074_v0, %v1968_v47  ;;  %v3017_v36 = vadd.f32 %v4084_v15, %v2016_v51 }
 0x31c   : > { %v2093_v17 = vmax.f32 %v2069_v22, 0.0  ;;  %v2105_v30 = vmax.f32 %v2081_v46, 0.0  ;;  %v2070_v60 = vadd.f32 %v2977_v54, %v4095_v56  ;;  %v2082_v12 = vadd.f32 %v3014_v57, %v4095_v56 }
 0x31d   : > { %v2091_v62 = vmax.f32 %v2067_v19, 0.0  ;;  %v2103_v10 = vmax.f32 %v2079_v61, 0.0  ;;  %v2068_v34 = vadd.f32 %v2981_v14, %v4095_v56  ;;  %v2080_v27 = vadd.f32 %v3017_v36, %v4095_v56 }
 0x31e   : > { %2117 = vst [vmem:[%s3268_s26 + $0x50] sm:$0xff] %v2093_v17  ;;  %2129 = vst [vmem:[%s3268_s26 + $0xb0] sm:$0xff] %v2105_v30  ;;  %v2094_v0 = vmax.f32 %v2070_v60, 0.0  ;;  %v2106_v15 = vmax.f32 %v2082_v12, 0.0 }
 0x31f   : > { %2115 = vst [vmem:[%s3268_s26 + $0x40] sm:$0xff] %v2091_v62  ;;  %2127 = vst [vmem:[%s3268_s26 + $0xa0] sm:$0xff] %v2103_v10  ;;  %v2092_v26 = vmax.f32 %v2068_v34, 0.0  ;;  %v2104_v63 = vmax.f32 %v2080_v27, 0.0 }
 0x320   : > { %2118 = vst [vmem:[%s3268_s26 + $0x58] sm:$0xff] %v2094_v0  ;;  %2130 = vst [vmem:[%s3268_s26 + $0xb8] sm:$0xff] %v2106_v15 }
 0x321   : > { %2116 = vst [vmem:[%s3268_s26 + $0x48] sm:$0xff] %v2092_v26  ;;  %2128 = vst [vmem:[%s3268_s26 + $0xa8] sm:$0xff] %v2104_v63 }
 0x322 PF: > { %s15_s20 = sadd.s32 1, %s3200_s20   ;;  %s4181_s18 = smov %s3196_s19 }
 0x323   : > { %p12_p8 = scmp.ge.s32.totalorder %s15_s20, 5   ;;  %s4182_s19 = smov %s4184_s21 }
 0x325   :  { %14 = sbr.rel (!%p12_p8) target bundleno = 2 (0x2), region = 120 }

</bundles_post_ra>
